<compile_context>
chip_gen: v7x
topology: tpu7x:2x2x1
jax: 0.10.0
libtpu: 0.0.40
codegen_flags: <defaults>
</compile_context>

<pallas_src>
import functools

import numpy as np
import jax
import jax.numpy as jnp
from jax.experimental import pallas as pl
from jax.experimental.pallas import tpu as pltpu


# ---------------------------------------------------------------------------
# One-time parameter preparation (plain numpy; runs once at init)
# ---------------------------------------------------------------------------
def _conv_toeplitz(w_oihw, w_in):
    """Per-kh matrices M[kh] of shape (W_in*IC, OW*OC) such that, with the
    activation laid out as a 2D (H, W*C) matrix (column = w*C + c), the conv is
        out = sum_kh  A[kh:kh+OH, :] @ M[kh]        (out column = ow*OC + oc).
    """
    oc, ic, kh_sz, kw_sz = w_oihw.shape
    ow = w_in - kw_sz + 1
    m = np.zeros((kh_sz, w_in * ic, ow * oc), np.float32)
    for kh in range(kh_sz):
        for kw in range(kw_sz):
            blk = np.asarray(w_oihw[:, :, kh, kw], np.float32).T      # (IC, OC)
            for o in range(ow):
                w_abs = o + kw
                m[kh, w_abs * ic:(w_abs + 1) * ic, o * oc:(o + 1) * oc] = blk
    return m


def _pool_selectors(oh, ow, c):
    """0/1 selection matrices so that a floor-mode 2x2/stride-2 max pool of a
    (OH, OW*C) activation is  max_dw( max_dh(R[dh] @ A) @ Csel[dw] )."""
    ph, pw = oh // 2, ow // 2
    r = np.zeros((2, ph, oh), np.float32)
    for dh in range(2):
        r[dh, np.arange(ph), 2 * np.arange(ph) + dh] = 1.0
    csel = np.zeros((2, ow * c, pw * c), np.float32)
    for dw in range(2):
        for p in range(pw):
            for ch in range(c):
                csel[dw, (2 * p + dw) * c + ch, p * c + ch] = 1.0
    return r, csel


def init_params(key):
    """PyTorch-default-style init, PyTorch weight layouts."""
    def uniform(k, shape, fan_in):
        bound = 1.0 / np.sqrt(float(fan_in))
        return jax.random.uniform(k, shape, jnp.float32, -bound, bound)

    ks = jax.random.split(key, 10)
    return {
        "conv1_w": uniform(ks[0], (6, 1, 3, 3), 1 * 3 * 3),
        "conv1_b": uniform(ks[1], (6,), 1 * 3 * 3),
        "conv2_w": uniform(ks[2], (16, 6, 3, 3), 6 * 3 * 3),
        "conv2_b": uniform(ks[3], (16,), 6 * 3 * 3),
        "fc1_w": uniform(ks[4], (120, 576), 576),   # PyTorch Linear: (out, in)
        "fc1_b": uniform(ks[5], (120,), 576),
        "fc2_w": uniform(ks[6], (84, 120), 120),
        "fc2_b": uniform(ks[7], (84,), 120),
        "fc3_w": uniform(ks[8], (10, 84), 84),
        "fc3_b": uniform(ks[9], (10,), 84),
    }


def prepare_params(params):
    """Transform PyTorch-layout params once into the kernel's resident form."""
    w1 = np.asarray(params["conv1_w"], np.float32)
    b1 = np.asarray(params["conv1_b"], np.float32)
    w2 = np.asarray(params["conv2_w"], np.float32)
    b2 = np.asarray(params["conv2_b"], np.float32)
    fc1_w = np.asarray(params["fc1_w"], np.float32)
    fc1_b = np.asarray(params["fc1_b"], np.float32)
    fc2_w = np.asarray(params["fc2_w"], np.float32)
    fc2_b = np.asarray(params["fc2_b"], np.float32)
    fc3_w = np.asarray(params["fc3_w"], np.float32)
    fc3_b = np.asarray(params["fc3_b"], np.float32)

    m1 = _conv_toeplitz(w1, 32)                 # (3, 32, 180)
    b1r = np.tile(b1, 30)[None, :]              # (1, 180)   col = ow*6 + oc
    r1, c1 = _pool_selectors(30, 30, 6)         # (2,15,30), (2,180,90)

    m2 = _conv_toeplitz(w2, 15)                 # (3, 90, 208)
    b2r = np.tile(b2, 13)[None, :]              # (1, 208)   col = ow*16 + oc
    r2, c2 = _pool_selectors(13, 13, 16)        # (2,6,13),  (2,208,96)

    # fc1: fold PyTorch's NCHW flatten (index c*36 + h*6 + w) into weights so
    # the kernel's (h, w*16 + c) activation layout can be used directly:
    #   fc1(j) = sum_h  p2[h, :] @ w1b[h, :, j]
    w1b = np.zeros((6, 96, 120), np.float32)
    for h in range(6):
        for w in range(6):
            for c in range(16):
                w1b[h, w * 16 + c, :] = fc1_w[:, c * 36 + h * 6 + w]
    fb1 = fc1_b[None, :]                        # (1, 120)

    w2t = np.ascontiguousarray(fc2_w.T)         # (120, 84)
    fb2 = fc2_b[None, :]
    w3t = np.ascontiguousarray(fc3_w.T)         # (84, 10)
    fb3 = fc3_b[None, :]

    arrs = (m1, b1r, r1, c1, m2, b2r, r2, c2, w1b, fb1, w2t, fb2, w3t, fb3)
    return tuple(jnp.asarray(a) for a in arrs)


# ---------------------------------------------------------------------------
# The fused kernel: one grid step == one batch element, everything in VMEM.
# ---------------------------------------------------------------------------
def _lenet_kernel(x_ref, m1_ref, b1_ref, r1_ref, c1_ref,
                  m2_ref, b2_ref, r2_ref, c2_ref,
                  w1b_ref, fb1_ref, w2_ref, fb2_ref, w3_ref, fb3_ref,
                  o_ref):
    dot = functools.partial(jnp.dot, preferred_element_type=jnp.float32)

    x = x_ref[0]                                              # (32, 32) = (H, W)

    # conv1 (3x3, 1->6) + bias + ReLU  -> (30, 180), col = ow*6 + oc
    a1 = dot(x[0:30, :], m1_ref[0])
    a1 = a1 + dot(x[1:31, :], m1_ref[1])
    a1 = a1 + dot(x[2:32, :], m1_ref[2])
    a1 = jnp.maximum(a1 + b1_ref[...], 0.0)

    # 2x2 max-pool -> (15, 90), col = w*6 + c
    rmax = jnp.maximum(dot(r1_ref[0], a1), dot(r1_ref[1], a1))       # (15, 180)
    p1 = jnp.maximum(dot(rmax, c1_ref[0]), dot(rmax, c1_ref[1]))     # (15, 90)

    # conv2 (3x3, 6->16) + bias + ReLU -> (13, 208), col = ow*16 + oc
    a2 = dot(p1[0:13, :], m2_ref[0])
    a2 = a2 + dot(p1[1:14, :], m2_ref[1])
    a2 = a2 + dot(p1[2:15, :], m2_ref[2])
    a2 = jnp.maximum(a2 + b2_ref[...], 0.0)

    # 2x2 max-pool (floor) -> (6, 96), col = w*16 + c
    rmax2 = jnp.maximum(dot(r2_ref[0], a2), dot(r2_ref[1], a2))      # (6, 208)
    p2 = jnp.maximum(dot(rmax2, c2_ref[0]), dot(rmax2, c2_ref[1]))   # (6, 96)

    # fc1 (576->120) + ReLU   (NCHW flatten order folded into w1b at prep time)
    h1 = dot(p2[0:1, :], w1b_ref[0])
    for h in range(1, 6):
        h1 = h1 + dot(p2[h:h + 1, :], w1b_ref[h])
    h1 = jnp.maximum(h1 + fb1_ref[...], 0.0)                          # (1, 120)

    # fc2 (120->84) + ReLU, fc3 (84->10)
    h2 = jnp.maximum(dot(h1, w2_ref[...]) + fb2_ref[...], 0.0)        # (1, 84)
    o_ref[0] = dot(h2, w3_ref[...]) + fb3_ref[...]                    # (1, 10)


def _resident_spec(shape):
    nd = len(shape)
    return pl.BlockSpec(shape, lambda n: (0,) * nd)   # same block every step


@jax.jit
def net_forward(x_nchw, prepped):
    n = x_nchw.shape[0]
    assert x_nchw.shape[1:] == (1, 32, 32)
    x = x_nchw.reshape(n, 32, 32).astype(jnp.float32)

    in_specs = [pl.BlockSpec((1, 32, 32), lambda i: (i, 0, 0))]
    in_specs += [_resident_spec(a.shape) for a in prepped]

    out = pl.pallas_call(
        _lenet_kernel,
        out_shape=jax.ShapeDtypeStruct((n, 1, 10), jnp.float32),
        grid=(n,),
        in_specs=in_specs,
        out_specs=pl.BlockSpec((1, 1, 10), lambda i: (i, 0, 0)),
        compiler_params=pltpu.CompilerParams(dimension_semantics=("parallel",)),
    )(x, *prepped)
    return out.reshape(n, 10)


# ---------------------------------------------------------------------------
# Pure-JAX reference (for correctness check)
# ---------------------------------------------------------------------------
@jax.jit
def reference_forward(x_nchw, params):
    dn = ("NCHW", "OIHW", "NCHW")
    x = jax.lax.conv_general_dilated(x_nchw, params["conv1_w"], (1, 1), "VALID",
                                     dimension_numbers=dn)
    x = jnp.maximum(x + params["conv1_b"][None, :, None, None], 0.0)
    x = jax.lax.reduce_window(x, -jnp.inf, jax.lax.max,
                              (1, 1, 2, 2), (1, 1, 2, 2), "VALID")
    x = jax.lax.conv_general_dilated(x, params["conv2_w"], (1, 1), "VALID",
                                     dimension_numbers=dn)
    x = jnp.maximum(x + params["conv2_b"][None, :, None, None], 0.0)
    x = jax.lax.reduce_window(x, -jnp.inf, jax.lax.max,
                              (1, 1, 2, 2), (1, 1, 2, 2), "VALID")
    x = x.reshape(x.shape[0], -1)                 # NCHW flatten, like PyTorch
    x = jnp.maximum(x @ params["fc1_w"].T + params["fc1_b"], 0.0)
    x = jnp.maximum(x @ params["fc2_w"].T + params["fc2_b"], 0.0)
    return x @ params["fc3_w"].T + params["fc3_b"]


if __name__ == "__main__":
    key = jax.random.PRNGKey(0)
    k_x, k_p = jax.random.split(key)
    # Net's fc1 (16*6*6) implies a 32x32 single-channel input (classic LeNet).
    x = jax.random.normal(k_x, (2, 1, 32, 32), dtype=jnp.float32)
    params = init_params(k_p)
    prepped = prepare_params(params)

    out = jax.block_until_ready(net_forward(x, prepped))
    assert out.shape == (2, 10) and out.dtype == jnp.float32

    ref = jax.block_until_ready(reference_forward(x, params))
    # Loose tolerance: both sides use default (bf16 multi-pass) MXU precision.
    np.testing.assert_allclose(np.asarray(out), np.asarray(ref),
                               rtol=5e-2, atol=1e-1)
    print("KERNEL_OK")
</pallas_src>

<mosaic_0001>
module attributes {stable_mosaic.version = 11 : i64} {
  func.func @_lenet_kernel(%arg0: i32, %arg1: memref<1x32x32xf32, #tpu.memory_space<vmem>>, %arg2: memref<3x32x180xf32, #tpu.memory_space<vmem>>, %arg3: memref<1x180xf32, #tpu.memory_space<vmem>>, %arg4: memref<2x15x30xf32, #tpu.memory_space<vmem>>, %arg5: memref<2x180x90xf32, #tpu.memory_space<vmem>>, %arg6: memref<3x90x208xf32, #tpu.memory_space<vmem>>, %arg7: memref<1x208xf32, #tpu.memory_space<vmem>>, %arg8: memref<2x6x13xf32, #tpu.memory_space<vmem>>, %arg9: memref<2x208x96xf32, #tpu.memory_space<vmem>>, %arg10: memref<6x96x120xf32, #tpu.memory_space<vmem>>, %arg11: memref<1x120xf32, #tpu.memory_space<vmem>>, %arg12: memref<120x84xf32, #tpu.memory_space<vmem>>, %arg13: memref<1x84xf32, #tpu.memory_space<vmem>>, %arg14: memref<84x10xf32, #tpu.memory_space<vmem>>, %arg15: memref<1x10xf32, #tpu.memory_space<vmem>>, %arg16: memref<1x1x10xf32, #tpu.memory_space<vmem>>) attributes {dimension_semantics = [#tpu.dimension_semantics<parallel>], iteration_bounds = array<i64: 2>, scalar_prefetch = 0 : i64, scratch_operands = 0 : i64, tpu.core_type = #tpu.core_type<tc>, window_params = [{transform_indices = @transform_0, window_bounds = array<i64: 1, 32, 32>}, {pipeline_mode = #tpu.pipeline_mode<synchronous>, transform_indices = @transform_1, window_bounds = array<i64: 3, 32, 180>}, {pipeline_mode = #tpu.pipeline_mode<synchronous>, transform_indices = @transform_2, window_bounds = array<i64: 1, 180>}, {pipeline_mode = #tpu.pipeline_mode<synchronous>, transform_indices = @transform_3, window_bounds = array<i64: 2, 15, 30>}, {pipeline_mode = #tpu.pipeline_mode<synchronous>, transform_indices = @transform_4, window_bounds = array<i64: 2, 180, 90>}, {pipeline_mode = #tpu.pipeline_mode<synchronous>, transform_indices = @transform_5, window_bounds = array<i64: 3, 90, 208>}, {pipeline_mode = #tpu.pipeline_mode<synchronous>, transform_indices = @transform_6, window_bounds = array<i64: 1, 208>}, {pipeline_mode = #tpu.pipeline_mode<synchronous>, transform_indices = @transform_7, window_bounds = array<i64: 2, 6, 13>}, {pipeline_mode = #tpu.pipeline_mode<synchronous>, transform_indices = @transform_8, window_bounds = array<i64: 2, 208, 96>}, {pipeline_mode = #tpu.pipeline_mode<synchronous>, transform_indices = @transform_9, window_bounds = array<i64: 6, 96, 120>}, {pipeline_mode = #tpu.pipeline_mode<synchronous>, transform_indices = @transform_10, window_bounds = array<i64: 1, 120>}, {pipeline_mode = #tpu.pipeline_mode<synchronous>, transform_indices = @transform_11, window_bounds = array<i64: 120, 84>}, {pipeline_mode = #tpu.pipeline_mode<synchronous>, transform_indices = @transform_12, window_bounds = array<i64: 1, 84>}, {pipeline_mode = #tpu.pipeline_mode<synchronous>, transform_indices = @transform_13, window_bounds = array<i64: 84, 10>}, {pipeline_mode = #tpu.pipeline_mode<synchronous>, transform_indices = @transform_14, window_bounds = array<i64: 1, 10>}, {transform_indices = @transform_15, window_bounds = array<i64: 1, 1, 10>}]} {
    %c0 = arith.constant 0 : index
    %c0_0 = arith.constant 0 : index
    %c0_1 = arith.constant 0 : index
    %0 = vector.load %arg1[%c0, %c0_0, %c0_1] : memref<1x32x32xf32, #tpu.memory_space<vmem>>, vector<1x32x32xf32>
    %1 = vector.shape_cast %0 : vector<1x32x32xf32> to vector<32x32xf32>
    %2 = vector.extract_strided_slice %1 {offsets = [0, 0], sizes = [30, 32], strides = [1, 1]} : vector<32x32xf32> to vector<30x32xf32>
    %c0_2 = arith.constant 0 : index
    %c0_3 = arith.constant 0 : index
    %c0_4 = arith.constant 0 : index
    %3 = vector.load %arg2[%c0_2, %c0_3, %c0_4] : memref<3x32x180xf32, #tpu.memory_space<vmem>>, vector<1x32x180xf32>
    %4 = vector.shape_cast %3 : vector<1x32x180xf32> to vector<32x180xf32>
    %cst = arith.constant dense<0.000000e+00> : vector<30x180xf32>
    %5 = tpu.matmul %2, %4, %cst {dimension_numbers = #tpu.dot_dimension_numbers<[1], [0], [0], [1], [0, 0, 1, 1], [], []>} : vector<30x32xf32>, vector<32x180xf32>, vector<30x180xf32> -> vector<30x180xf32>
    %6 = vector.extract_strided_slice %1 {offsets = [1, 0], sizes = [30, 32], strides = [1, 1]} : vector<32x32xf32> to vector<30x32xf32>
    %c1 = arith.constant 1 : index
    %c0_5 = arith.constant 0 : index
    %c0_6 = arith.constant 0 : index
    %7 = vector.load %arg2[%c1, %c0_5, %c0_6] : memref<3x32x180xf32, #tpu.memory_space<vmem>>, vector<1x32x180xf32>
    %8 = vector.shape_cast %7 : vector<1x32x180xf32> to vector<32x180xf32>
    %cst_7 = arith.constant dense<0.000000e+00> : vector<30x180xf32>
    %9 = tpu.matmul %6, %8, %cst_7 {dimension_numbers = #tpu.dot_dimension_numbers<[1], [0], [0], [1], [0, 0, 1, 1], [], []>} : vector<30x32xf32>, vector<32x180xf32>, vector<30x180xf32> -> vector<30x180xf32>
    %10 = arith.addf %5, %9 : vector<30x180xf32>
    %11 = vector.extract_strided_slice %1 {offsets = [2, 0], sizes = [30, 32], strides = [1, 1]} : vector<32x32xf32> to vector<30x32xf32>
    %c2 = arith.constant 2 : index
    %c0_8 = arith.constant 0 : index
    %c0_9 = arith.constant 0 : index
    %12 = vector.load %arg2[%c2, %c0_8, %c0_9] : memref<3x32x180xf32, #tpu.memory_space<vmem>>, vector<1x32x180xf32>
    %13 = vector.shape_cast %12 : vector<1x32x180xf32> to vector<32x180xf32>
    %cst_10 = arith.constant dense<0.000000e+00> : vector<30x180xf32>
    %14 = tpu.matmul %11, %13, %cst_10 {dimension_numbers = #tpu.dot_dimension_numbers<[1], [0], [0], [1], [0, 0, 1, 1], [], []>} : vector<30x32xf32>, vector<32x180xf32>, vector<30x180xf32> -> vector<30x180xf32>
    %15 = arith.addf %10, %14 : vector<30x180xf32>
    %c0_11 = arith.constant 0 : index
    %c0_12 = arith.constant 0 : index
    %16 = vector.load %arg3[%c0_11, %c0_12] : memref<1x180xf32, #tpu.memory_space<vmem>>, vector<1x180xf32>
    %17 = vector.broadcast %16 : vector<1x180xf32> to vector<30x180xf32>
    %18 = arith.addf %15, %17 : vector<30x180xf32>
    %cst_13 = arith.constant 0.000000e+00 : f32
    %19 = vector.broadcast %cst_13 : f32 to vector<30x180xf32>
    %20 = arith.maximumf %18, %19 : vector<30x180xf32>
    %c0_14 = arith.constant 0 : index
    %c0_15 = arith.constant 0 : index
    %c0_16 = arith.constant 0 : index
    %21 = vector.load %arg4[%c0_14, %c0_15, %c0_16] : memref<2x15x30xf32, #tpu.memory_space<vmem>>, vector<1x15x30xf32>
    %22 = vector.shape_cast %21 : vector<1x15x30xf32> to vector<15x30xf32>
    %cst_17 = arith.constant dense<0.000000e+00> : vector<15x180xf32>
    %23 = tpu.matmul %22, %20, %cst_17 {dimension_numbers = #tpu.dot_dimension_numbers<[1], [0], [0], [1], [0, 0, 1, 1], [], []>} : vector<15x30xf32>, vector<30x180xf32>, vector<15x180xf32> -> vector<15x180xf32>
    %c1_18 = arith.constant 1 : index
    %c0_19 = arith.constant 0 : index
    %c0_20 = arith.constant 0 : index
    %24 = vector.load %arg4[%c1_18, %c0_19, %c0_20] : memref<2x15x30xf32, #tpu.memory_space<vmem>>, vector<1x15x30xf32>
    %25 = vector.shape_cast %24 : vector<1x15x30xf32> to vector<15x30xf32>
    %cst_21 = arith.constant dense<0.000000e+00> : vector<15x180xf32>
    %26 = tpu.matmul %25, %20, %cst_21 {dimension_numbers = #tpu.dot_dimension_numbers<[1], [0], [0], [1], [0, 0, 1, 1], [], []>} : vector<15x30xf32>, vector<30x180xf32>, vector<15x180xf32> -> vector<15x180xf32>
    %27 = arith.maximumf %23, %26 : vector<15x180xf32>
    %c0_22 = arith.constant 0 : index
    %c0_23 = arith.constant 0 : index
    %c0_24 = arith.constant 0 : index
    %28 = vector.load %arg5[%c0_22, %c0_23, %c0_24] : memref<2x180x90xf32, #tpu.memory_space<vmem>>, vector<1x180x90xf32>
    %29 = vector.shape_cast %28 : vector<1x180x90xf32> to vector<180x90xf32>
    %cst_25 = arith.constant dense<0.000000e+00> : vector<15x90xf32>
    %30 = tpu.matmul %27, %29, %cst_25 {dimension_numbers = #tpu.dot_dimension_numbers<[1], [0], [0], [1], [0, 0, 1, 1], [], []>} : vector<15x180xf32>, vector<180x90xf32>, vector<15x90xf32> -> vector<15x90xf32>
    %c1_26 = arith.constant 1 : index
    %c0_27 = arith.constant 0 : index
    %c0_28 = arith.constant 0 : index
    %31 = vector.load %arg5[%c1_26, %c0_27, %c0_28] : memref<2x180x90xf32, #tpu.memory_space<vmem>>, vector<1x180x90xf32>
    %32 = vector.shape_cast %31 : vector<1x180x90xf32> to vector<180x90xf32>
    %cst_29 = arith.constant dense<0.000000e+00> : vector<15x90xf32>
    %33 = tpu.matmul %27, %32, %cst_29 {dimension_numbers = #tpu.dot_dimension_numbers<[1], [0], [0], [1], [0, 0, 1, 1], [], []>} : vector<15x180xf32>, vector<180x90xf32>, vector<15x90xf32> -> vector<15x90xf32>
    %34 = arith.maximumf %30, %33 : vector<15x90xf32>
    %35 = vector.extract_strided_slice %34 {offsets = [0, 0], sizes = [13, 90], strides = [1, 1]} : vector<15x90xf32> to vector<13x90xf32>
    %c0_30 = arith.constant 0 : index
    %c0_31 = arith.constant 0 : index
    %c0_32 = arith.constant 0 : index
    %36 = vector.load %arg6[%c0_30, %c0_31, %c0_32] : memref<3x90x208xf32, #tpu.memory_space<vmem>>, vector<1x90x208xf32>
    %37 = vector.shape_cast %36 : vector<1x90x208xf32> to vector<90x208xf32>
    %cst_33 = arith.constant dense<0.000000e+00> : vector<13x208xf32>
    %38 = tpu.matmul %35, %37, %cst_33 {dimension_numbers = #tpu.dot_dimension_numbers<[1], [0], [0], [1], [0, 0, 1, 1], [], []>} : vector<13x90xf32>, vector<90x208xf32>, vector<13x208xf32> -> vector<13x208xf32>
    %39 = vector.extract_strided_slice %34 {offsets = [1, 0], sizes = [13, 90], strides = [1, 1]} : vector<15x90xf32> to vector<13x90xf32>
    %c1_34 = arith.constant 1 : index
    %c0_35 = arith.constant 0 : index
    %c0_36 = arith.constant 0 : index
    %40 = vector.load %arg6[%c1_34, %c0_35, %c0_36] : memref<3x90x208xf32, #tpu.memory_space<vmem>>, vector<1x90x208xf32>
    %41 = vector.shape_cast %40 : vector<1x90x208xf32> to vector<90x208xf32>
    %cst_37 = arith.constant dense<0.000000e+00> : vector<13x208xf32>
    %42 = tpu.matmul %39, %41, %cst_37 {dimension_numbers = #tpu.dot_dimension_numbers<[1], [0], [0], [1], [0, 0, 1, 1], [], []>} : vector<13x90xf32>, vector<90x208xf32>, vector<13x208xf32> -> vector<13x208xf32>
    %43 = arith.addf %38, %42 : vector<13x208xf32>
    %44 = vector.extract_strided_slice %34 {offsets = [2, 0], sizes = [13, 90], strides = [1, 1]} : vector<15x90xf32> to vector<13x90xf32>
    %c2_38 = arith.constant 2 : index
    %c0_39 = arith.constant 0 : index
    %c0_40 = arith.constant 0 : index
    %45 = vector.load %arg6[%c2_38, %c0_39, %c0_40] : memref<3x90x208xf32, #tpu.memory_space<vmem>>, vector<1x90x208xf32>
    %46 = vector.shape_cast %45 : vector<1x90x208xf32> to vector<90x208xf32>
    %cst_41 = arith.constant dense<0.000000e+00> : vector<13x208xf32>
    %47 = tpu.matmul %44, %46, %cst_41 {dimension_numbers = #tpu.dot_dimension_numbers<[1], [0], [0], [1], [0, 0, 1, 1], [], []>} : vector<13x90xf32>, vector<90x208xf32>, vector<13x208xf32> -> vector<13x208xf32>
    %48 = arith.addf %43, %47 : vector<13x208xf32>
    %c0_42 = arith.constant 0 : index
    %c0_43 = arith.constant 0 : index
    %49 = vector.load %arg7[%c0_42, %c0_43] : memref<1x208xf32, #tpu.memory_space<vmem>>, vector<1x208xf32>
    %50 = vector.broadcast %49 : vector<1x208xf32> to vector<13x208xf32>
    %51 = arith.addf %48, %50 : vector<13x208xf32>
    %cst_44 = arith.constant 0.000000e+00 : f32
    %52 = vector.broadcast %cst_44 : f32 to vector<13x208xf32>
    %53 = arith.maximumf %51, %52 : vector<13x208xf32>
    %c0_45 = arith.constant 0 : index
    %c0_46 = arith.constant 0 : index
    %c0_47 = arith.constant 0 : index
    %54 = vector.load %arg8[%c0_45, %c0_46, %c0_47] : memref<2x6x13xf32, #tpu.memory_space<vmem>>, vector<1x6x13xf32>
    %55 = vector.shape_cast %54 : vector<1x6x13xf32> to vector<6x13xf32>
    %cst_48 = arith.constant dense<0.000000e+00> : vector<6x208xf32>
    %56 = tpu.matmul %55, %53, %cst_48 {dimension_numbers = #tpu.dot_dimension_numbers<[1], [0], [0], [1], [0, 0, 1, 1], [], []>} : vector<6x13xf32>, vector<13x208xf32>, vector<6x208xf32> -> vector<6x208xf32>
    %c1_49 = arith.constant 1 : index
    %c0_50 = arith.constant 0 : index
    %c0_51 = arith.constant 0 : index
    %57 = vector.load %arg8[%c1_49, %c0_50, %c0_51] : memref<2x6x13xf32, #tpu.memory_space<vmem>>, vector<1x6x13xf32>
    %58 = vector.shape_cast %57 : vector<1x6x13xf32> to vector<6x13xf32>
    %cst_52 = arith.constant dense<0.000000e+00> : vector<6x208xf32>
    %59 = tpu.matmul %58, %53, %cst_52 {dimension_numbers = #tpu.dot_dimension_numbers<[1], [0], [0], [1], [0, 0, 1, 1], [], []>} : vector<6x13xf32>, vector<13x208xf32>, vector<6x208xf32> -> vector<6x208xf32>
    %60 = arith.maximumf %56, %59 : vector<6x208xf32>
    %c0_53 = arith.constant 0 : index
    %c0_54 = arith.constant 0 : index
    %c0_55 = arith.constant 0 : index
    %61 = vector.load %arg9[%c0_53, %c0_54, %c0_55] : memref<2x208x96xf32, #tpu.memory_space<vmem>>, vector<1x208x96xf32>
    %62 = vector.shape_cast %61 : vector<1x208x96xf32> to vector<208x96xf32>
    %cst_56 = arith.constant dense<0.000000e+00> : vector<6x96xf32>
    %63 = tpu.matmul %60, %62, %cst_56 {dimension_numbers = #tpu.dot_dimension_numbers<[1], [0], [0], [1], [0, 0, 1, 1], [], []>} : vector<6x208xf32>, vector<208x96xf32>, vector<6x96xf32> -> vector<6x96xf32>
    %c1_57 = arith.constant 1 : index
    %c0_58 = arith.constant 0 : index
    %c0_59 = arith.constant 0 : index
    %64 = vector.load %arg9[%c1_57, %c0_58, %c0_59] : memref<2x208x96xf32, #tpu.memory_space<vmem>>, vector<1x208x96xf32>
    %65 = vector.shape_cast %64 : vector<1x208x96xf32> to vector<208x96xf32>
    %cst_60 = arith.constant dense<0.000000e+00> : vector<6x96xf32>
    %66 = tpu.matmul %60, %65, %cst_60 {dimension_numbers = #tpu.dot_dimension_numbers<[1], [0], [0], [1], [0, 0, 1, 1], [], []>} : vector<6x208xf32>, vector<208x96xf32>, vector<6x96xf32> -> vector<6x96xf32>
    %67 = arith.maximumf %63, %66 : vector<6x96xf32>
    %68 = vector.extract_strided_slice %67 {offsets = [0, 0], sizes = [1, 96], strides = [1, 1]} : vector<6x96xf32> to vector<1x96xf32>
    %c0_61 = arith.constant 0 : index
    %c0_62 = arith.constant 0 : index
    %c0_63 = arith.constant 0 : index
    %69 = vector.load %arg10[%c0_61, %c0_62, %c0_63] : memref<6x96x120xf32, #tpu.memory_space<vmem>>, vector<1x96x120xf32>
    %70 = vector.shape_cast %69 : vector<1x96x120xf32> to vector<96x120xf32>
    %cst_64 = arith.constant dense<0.000000e+00> : vector<1x120xf32>
    %71 = tpu.matmul %68, %70, %cst_64 {dimension_numbers = #tpu.dot_dimension_numbers<[1], [0], [0], [1], [0, 0, 1, 1], [], []>} : vector<1x96xf32>, vector<96x120xf32>, vector<1x120xf32> -> vector<1x120xf32>
    %72 = vector.extract_strided_slice %67 {offsets = [1, 0], sizes = [1, 96], strides = [1, 1]} : vector<6x96xf32> to vector<1x96xf32>
    %c1_65 = arith.constant 1 : index
    %c0_66 = arith.constant 0 : index
    %c0_67 = arith.constant 0 : index
    %73 = vector.load %arg10[%c1_65, %c0_66, %c0_67] : memref<6x96x120xf32, #tpu.memory_space<vmem>>, vector<1x96x120xf32>
    %74 = vector.shape_cast %73 : vector<1x96x120xf32> to vector<96x120xf32>
    %cst_68 = arith.constant dense<0.000000e+00> : vector<1x120xf32>
    %75 = tpu.matmul %72, %74, %cst_68 {dimension_numbers = #tpu.dot_dimension_numbers<[1], [0], [0], [1], [0, 0, 1, 1], [], []>} : vector<1x96xf32>, vector<96x120xf32>, vector<1x120xf32> -> vector<1x120xf32>
    %76 = arith.addf %71, %75 : vector<1x120xf32>
    %77 = vector.extract_strided_slice %67 {offsets = [2, 0], sizes = [1, 96], strides = [1, 1]} : vector<6x96xf32> to vector<1x96xf32>
    %c2_69 = arith.constant 2 : index
    %c0_70 = arith.constant 0 : index
    %c0_71 = arith.constant 0 : index
    %78 = vector.load %arg10[%c2_69, %c0_70, %c0_71] : memref<6x96x120xf32, #tpu.memory_space<vmem>>, vector<1x96x120xf32>
    %79 = vector.shape_cast %78 : vector<1x96x120xf32> to vector<96x120xf32>
    %cst_72 = arith.constant dense<0.000000e+00> : vector<1x120xf32>
    %80 = tpu.matmul %77, %79, %cst_72 {dimension_numbers = #tpu.dot_dimension_numbers<[1], [0], [0], [1], [0, 0, 1, 1], [], []>} : vector<1x96xf32>, vector<96x120xf32>, vector<1x120xf32> -> vector<1x120xf32>
    %81 = arith.addf %76, %80 : vector<1x120xf32>
    %82 = vector.extract_strided_slice %67 {offsets = [3, 0], sizes = [1, 96], strides = [1, 1]} : vector<6x96xf32> to vector<1x96xf32>
    %c3 = arith.constant 3 : index
    %c0_73 = arith.constant 0 : index
    %c0_74 = arith.constant 0 : index
    %83 = vector.load %arg10[%c3, %c0_73, %c0_74] : memref<6x96x120xf32, #tpu.memory_space<vmem>>, vector<1x96x120xf32>
    %84 = vector.shape_cast %83 : vector<1x96x120xf32> to vector<96x120xf32>
    %cst_75 = arith.constant dense<0.000000e+00> : vector<1x120xf32>
    %85 = tpu.matmul %82, %84, %cst_75 {dimension_numbers = #tpu.dot_dimension_numbers<[1], [0], [0], [1], [0, 0, 1, 1], [], []>} : vector<1x96xf32>, vector<96x120xf32>, vector<1x120xf32> -> vector<1x120xf32>
    %86 = arith.addf %81, %85 : vector<1x120xf32>
    %87 = vector.extract_strided_slice %67 {offsets = [4, 0], sizes = [1, 96], strides = [1, 1]} : vector<6x96xf32> to vector<1x96xf32>
    %c4 = arith.constant 4 : index
    %c0_76 = arith.constant 0 : index
    %c0_77 = arith.constant 0 : index
    %88 = vector.load %arg10[%c4, %c0_76, %c0_77] : memref<6x96x120xf32, #tpu.memory_space<vmem>>, vector<1x96x120xf32>
    %89 = vector.shape_cast %88 : vector<1x96x120xf32> to vector<96x120xf32>
    %cst_78 = arith.constant dense<0.000000e+00> : vector<1x120xf32>
    %90 = tpu.matmul %87, %89, %cst_78 {dimension_numbers = #tpu.dot_dimension_numbers<[1], [0], [0], [1], [0, 0, 1, 1], [], []>} : vector<1x96xf32>, vector<96x120xf32>, vector<1x120xf32> -> vector<1x120xf32>
    %91 = arith.addf %86, %90 : vector<1x120xf32>
    %92 = vector.extract_strided_slice %67 {offsets = [5, 0], sizes = [1, 96], strides = [1, 1]} : vector<6x96xf32> to vector<1x96xf32>
    %c5 = arith.constant 5 : index
    %c0_79 = arith.constant 0 : index
    %c0_80 = arith.constant 0 : index
    %93 = vector.load %arg10[%c5, %c0_79, %c0_80] : memref<6x96x120xf32, #tpu.memory_space<vmem>>, vector<1x96x120xf32>
    %94 = vector.shape_cast %93 : vector<1x96x120xf32> to vector<96x120xf32>
    %cst_81 = arith.constant dense<0.000000e+00> : vector<1x120xf32>
    %95 = tpu.matmul %92, %94, %cst_81 {dimension_numbers = #tpu.dot_dimension_numbers<[1], [0], [0], [1], [0, 0, 1, 1], [], []>} : vector<1x96xf32>, vector<96x120xf32>, vector<1x120xf32> -> vector<1x120xf32>
    %96 = arith.addf %91, %95 : vector<1x120xf32>
    %c0_82 = arith.constant 0 : index
    %c0_83 = arith.constant 0 : index
    %97 = vector.load %arg11[%c0_82, %c0_83] : memref<1x120xf32, #tpu.memory_space<vmem>>, vector<1x120xf32>
    %98 = arith.addf %96, %97 : vector<1x120xf32>
    %cst_84 = arith.constant 0.000000e+00 : f32
    %99 = vector.broadcast %cst_84 : f32 to vector<1x120xf32>
    %100 = arith.maximumf %98, %99 : vector<1x120xf32>
    %c0_85 = arith.constant 0 : index
    %c0_86 = arith.constant 0 : index
    %101 = vector.load %arg12[%c0_85, %c0_86] : memref<120x84xf32, #tpu.memory_space<vmem>>, vector<120x84xf32>
    %cst_87 = arith.constant dense<0.000000e+00> : vector<1x84xf32>
    %102 = tpu.matmul %100, %101, %cst_87 {dimension_numbers = #tpu.dot_dimension_numbers<[1], [0], [0], [1], [0, 0, 1, 1], [], []>} : vector<1x120xf32>, vector<120x84xf32>, vector<1x84xf32> -> vector<1x84xf32>
    %c0_88 = arith.constant 0 : index
    %c0_89 = arith.constant 0 : index
    %103 = vector.load %arg13[%c0_88, %c0_89] : memref<1x84xf32, #tpu.memory_space<vmem>>, vector<1x84xf32>
    %104 = arith.addf %102, %103 : vector<1x84xf32>
    %cst_90 = arith.constant 0.000000e+00 : f32
    %105 = vector.broadcast %cst_90 : f32 to vector<1x84xf32>
    %106 = arith.maximumf %104, %105 : vector<1x84xf32>
    %c0_91 = arith.constant 0 : index
    %c0_92 = arith.constant 0 : index
    %107 = vector.load %arg14[%c0_91, %c0_92] : memref<84x10xf32, #tpu.memory_space<vmem>>, vector<84x10xf32>
    %cst_93 = arith.constant dense<0.000000e+00> : vector<1x10xf32>
    %108 = tpu.matmul %106, %107, %cst_93 {dimension_numbers = #tpu.dot_dimension_numbers<[1], [0], [0], [1], [0, 0, 1, 1], [], []>} : vector<1x84xf32>, vector<84x10xf32>, vector<1x10xf32> -> vector<1x10xf32>
    %c0_94 = arith.constant 0 : index
    %c0_95 = arith.constant 0 : index
    %109 = vector.load %arg15[%c0_94, %c0_95] : memref<1x10xf32, #tpu.memory_space<vmem>>, vector<1x10xf32>
    %110 = arith.addf %108, %109 : vector<1x10xf32>
    %c0_96 = arith.constant 0 : index
    %c0_97 = arith.constant 0 : index
    %c0_98 = arith.constant 0 : index
    %111 = vector.load %arg16[%c0_96, %c0_97, %c0_98] : memref<1x1x10xf32, #tpu.memory_space<vmem>>, vector<1x1x10xf32>
    %112 = vector.shape_cast %111 : vector<1x1x10xf32> to vector<1x10xf32>
    %113 = vector.shape_cast %110 : vector<1x10xf32> to vector<1x1x10xf32>
    tpu.vector_store %arg16[%c0_96, %c0_97, %c0_98], %113 {strides = array<i32>} : memref<1x1x10xf32, #tpu.memory_space<vmem>>, vector<1x1x10xf32>,
    return
  }
  func.func @transform_0(%arg0: i32) -> (i32, i32, i32) {
    %c0_i32 = arith.constant 0 : i32
    %c0_i32_0 = arith.constant 0 : i32
    %c0_i32_1 = arith.constant 0 : i32
    return %arg0, %c0_i32, %c0_i32_0 : i32, i32, i32
  }
  func.func @transform_1(%arg0: i32) -> (i32, i32, i32) {
    %c0_i32 = arith.constant 0 : i32
    %c0_i32_0 = arith.constant 0 : i32
    %c0_i32_1 = arith.constant 0 : i32
    %c0_i32_2 = arith.constant 0 : i32
    return %c0_i32, %c0_i32_0, %c0_i32_1 : i32, i32, i32
  }
  func.func @transform_2(%arg0: i32) -> (i32, i32) {
    %c0_i32 = arith.constant 0 : i32
    %c0_i32_0 = arith.constant 0 : i32
    %c0_i32_1 = arith.constant 0 : i32
    return %c0_i32, %c0_i32_0 : i32, i32
  }
  func.func @transform_3(%arg0: i32) -> (i32, i32, i32) {
    %c0_i32 = arith.constant 0 : i32
    %c0_i32_0 = arith.constant 0 : i32
    %c0_i32_1 = arith.constant 0 : i32
    %c0_i32_2 = arith.constant 0 : i32
    return %c0_i32, %c0_i32_0, %c0_i32_1 : i32, i32, i32
  }
  func.func @transform_4(%arg0: i32) -> (i32, i32, i32) {
    %c0_i32 = arith.constant 0 : i32
    %c0_i32_0 = arith.constant 0 : i32
    %c0_i32_1 = arith.constant 0 : i32
    %c0_i32_2 = arith.constant 0 : i32
    return %c0_i32, %c0_i32_0, %c0_i32_1 : i32, i32, i32
  }
  func.func @transform_5(%arg0: i32) -> (i32, i32, i32) {
    %c0_i32 = arith.constant 0 : i32
    %c0_i32_0 = arith.constant 0 : i32
    %c0_i32_1 = arith.constant 0 : i32
    %c0_i32_2 = arith.constant 0 : i32
    return %c0_i32, %c0_i32_0, %c0_i32_1 : i32, i32, i32
  }
  func.func @transform_6(%arg0: i32) -> (i32, i32) {
    %c0_i32 = arith.constant 0 : i32
    %c0_i32_0 = arith.constant 0 : i32
    %c0_i32_1 = arith.constant 0 : i32
    return %c0_i32, %c0_i32_0 : i32, i32
  }
  func.func @transform_7(%arg0: i32) -> (i32, i32, i32) {
    %c0_i32 = arith.constant 0 : i32
    %c0_i32_0 = arith.constant 0 : i32
    %c0_i32_1 = arith.constant 0 : i32
    %c0_i32_2 = arith.constant 0 : i32
    return %c0_i32, %c0_i32_0, %c0_i32_1 : i32, i32, i32
  }
  func.func @transform_8(%arg0: i32) -> (i32, i32, i32) {
    %c0_i32 = arith.constant 0 : i32
    %c0_i32_0 = arith.constant 0 : i32
    %c0_i32_1 = arith.constant 0 : i32
    %c0_i32_2 = arith.constant 0 : i32
    return %c0_i32, %c0_i32_0, %c0_i32_1 : i32, i32, i32
  }
  func.func @transform_9(%arg0: i32) -> (i32, i32, i32) {
    %c0_i32 = arith.constant 0 : i32
    %c0_i32_0 = arith.constant 0 : i32
    %c0_i32_1 = arith.constant 0 : i32
    %c0_i32_2 = arith.constant 0 : i32
    return %c0_i32, %c0_i32_0, %c0_i32_1 : i32, i32, i32
  }
  func.func @transform_10(%arg0: i32) -> (i32, i32) {
    %c0_i32 = arith.constant 0 : i32
    %c0_i32_0 = arith.constant 0 : i32
    %c0_i32_1 = arith.constant 0 : i32
    return %c0_i32, %c0_i32_0 : i32, i32
  }
  func.func @transform_11(%arg0: i32) -> (i32, i32) {
    %c0_i32 = arith.constant 0 : i32
    %c0_i32_0 = arith.constant 0 : i32
    %c0_i32_1 = arith.constant 0 : i32
    return %c0_i32, %c0_i32_0 : i32, i32
  }
  func.func @transform_12(%arg0: i32) -> (i32, i32) {
    %c0_i32 = arith.constant 0 : i32
    %c0_i32_0 = arith.constant 0 : i32
    %c0_i32_1 = arith.constant 0 : i32
    return %c0_i32, %c0_i32_0 : i32, i32
  }
  func.func @transform_13(%arg0: i32) -> (i32, i32) {
    %c0_i32 = arith.constant 0 : i32
    %c0_i32_0 = arith.constant 0 : i32
    %c0_i32_1 = arith.constant 0 : i32
    return %c0_i32, %c0_i32_0 : i32, i32
  }
  func.func @transform_14(%arg0: i32) -> (i32, i32) {
    %c0_i32 = arith.constant 0 : i32
    %c0_i32_0 = arith.constant 0 : i32
    %c0_i32_1 = arith.constant 0 : i32
    return %c0_i32, %c0_i32_0 : i32, i32
  }
  func.func @transform_15(%arg0: i32) -> (i32, i32, i32) {
    %c0_i32 = arith.constant 0 : i32
    %c0_i32_0 = arith.constant 0 : i32
    %c0_i32_1 = arith.constant 0 : i32
    return %arg0, %c0_i32, %c0_i32_0 : i32, i32, i32
  }
}

</mosaic_0001>

<bundles_post_ra>
// kernel: net_forward.1
= control target key start
LH: loop header
LB: loop body
LE: loop exit
PB: predicated region body
PF: predicated region fallthrough
CT: control target
= control target key end

     0   :  { %s5407_s0 = inlined_call_operand.hbm [shape: f32[2,32,32], index: 0, kind: input, shape index: {}]   ;;  %s5408_s1 = inlined_call_operand.hbm [shape: f32[3,32,180], index: 1, kind: input, shape index: {}]   ;;  %s5409_s2 = inlined_call_operand.vmem [shape: f32[1,180], index: 2, kind: input, shape index: {}]   ;;  %s5410_s3 = inlined_call_operand.vmem [shape: f32[2,15,30], index: 3, kind: input, shape index: {}]   ;;  %s5411_s4 = inlined_call_operand.vmem [shape: f32[2,180,90], index: 4, kind: input, shape index: {}]   ;;  %s5412_s5 = inlined_call_operand.vmem [shape: f32[3,90,208], index: 5, kind: input, shape index: {}]   ;;  %s5413_s6 = inlined_call_operand.vmem [shape: f32[1,208], index: 6, kind: input, shape index: {}]   ;;  %s5414_s7 = inlined_call_operand.vmem [shape: f32[2,6,13], index: 7, kind: input, shape index: {}]   ;;  %s5415_s8 = inlined_call_operand.vmem [shape: f32[2,208,96], index: 8, kind: input, shape index: {}]   ;;  %s5416_s9 = inlined_call_operand.vmem [shape: f32[6,96,120], index: 9, kind: input, shape index: {}]   ;;  %s5417_s10 = inlined_call_operand.vmem [shape: f32[1,120], index: 10, kind: input, shape index: {}]   ;;  %s5418_s11 = inlined_call_operand.vmem [shape: f32[120,84], index: 11, kind: input, shape index: {}]   ;;  %s5419_s12 = inlined_call_operand.vmem [shape: f32[1,84], index: 12, kind: input, shape index: {}]   ;;  %s5420_s13 = inlined_call_operand.vmem [shape: f32[84,10], index: 13, kind: input, shape index: {}]   ;;  %s5421_s14 = inlined_call_operand.vmem [shape: f32[1,10], index: 14, kind: input, shape index: {}]   ;;  %s5422_s15 = inlined_call_operand.hbm [shape: f32[2,1,10], index: 15, kind: output, shape index: {}]  }
   0x1   :  { %5432 = sst [smem:[#allocation14_spill]] %s5417_s10 }
   0x2   :  { %5433 = sst [smem:[#allocation15_spill]] %s5419_s12 }
   0x3   :  { %5434 = sst [smem:[#allocation16_spill]] %s5420_s13 }
   0x4   :  { %5435 = sst [smem:[#allocation17_spill]] %s5421_s14 }
   0x5   :  { %5436 = sst [smem:[#allocation18_spill]] %s5422_s15 }
   0x6   :  { %20 = vsyncpa [#allocation3], 0 }
   0x7   :  { %22 = vsyncpa [#allocation3 + $0x1], 0 }
   0x8   :  { %23 = vsyncpa [#allocation6], 0 }
   0x9   :  { %24 = vsyncpa [#allocation4], 0 }
   0xa   :  { %26 = vsyncpa [#allocation4 + $0x1], 0  ;;  %s4109_s18 = smov 0   ;;  %s4111_s19 = smov 0  }
   0xb   :  { %s4113_s20 = smov 0   ;;  %s4115_s21 = smov 0  }
   0xc LB: > { %5437 = sst [smem:[#allocation11_spill]] %s4004_s18  ;;  %s4130_s22 = sadd.s32 4294967295, %s4016_s21   ;;  %s4016_s21 = sphi %s4115_s21, %s5462_s21   ;;  %s4012_s20 = sphi %s4113_s20, %s5465_s20   ;;  %s4008_s19 = sphi %s4111_s19, %s5464_s19   ;;  %s4004_s18 = sphi %s4109_s18, %s5463_s18  }
   0xd   : > { %s2822_s23 = sadd.s32 4294967294, %s4016_s21   ;;  %p52_p0 = scmp.ne.s32.totalorder %s4008_s19, %s4004_s18 }
   0xe   : > { %p5428_p1 = scmp.eq.s32.totalorder %s4130_s22, 0  ;;  %p376_p3 = scmp.eq.s32.totalorder %s2822_s23, 1 }
   0xf   : > { %p2823_p5 = scmp.ge.s32.totalorder %s4016_s21, 1  ;;  %p383_p7 = scmp.lt.s32.totalorder %s4016_s21, 3 }
  0x10   : > { %p4139_p4 = por %p5428_p1, %p52_p0  ;;  %p4144_p6 = por %p376_p3, %p52_p0 }
  0x11   : > { %p4149_p8 = pnand %p2823_p5, %p383_p7  ;;  %s4018_s27 = smov [#allocation5]  }
  0x12   : > { %s5438_s24 = scalar_select %p4139_p4, 1, 0 }
  0x13   : > { %s5439_s25 = scalar_select %p4144_p6, 1, 0 }
  0x14   : > { %s5441_s26 = scalar_select %p4149_p8, 1, 0 }
  0x15   : > { %5440 = sst [smem:[#allocation12_spill]] %s5439_s25  ;;  %s395_s28 = sshll.u32 %s4018_s27, 4  ;;  %s4153_s28 = int_to_ptr.vmem [resolvable:$true] %s395_s28 }
  0x16   : > { %p3831_p9 = pneg %p4149_p8  ;;  %s4165_s30 = sadd.s32 1, %s4016_s21  }
  0x17   : > { %5443 = sst [smem:[#allocation13_spill]] %s4165_s30  ;;  %s39_s16 = sadd.s32 1, %s4012_s20 }
  0x18   : > { %p4160_p11 = pnand %p3831_p9, %p5428_p1  ;;  %s36_s17 = ssub.s32 %s4016_s21, %s4165_s30 }
  0x19   : > { %s3888_s27 = scalar_lea.hbm %s5408_s1, 3072 }
  0x1a   : > { %p3889_p12 = scmp.ne.s32.totalorder %s5408_s1, %s3888_s27  ;;  %p3890_p13 = pneg %p4160_p11 }
  0x1b   : > { %p3895_p5 = scmp.lt.u32.totalorder %s3888_s27, %s5408_s1 }
  0x1c   : > { %p3891_p0 = pnand %p3890_p13, %p3889_p12 }
  0x1e   : > { %p3892_p3 = pneg %p3891_p0 }
  0x20   : > { %p3897_p7 = pnand %p3895_p5, %p3892_p3 }
  0x22   : > { %3900 = shalt.err (!%p3897_p7)
}
  0x23   : > { %s3901_s30 = scalar_lea.vmem %s4153_s28, 3072  ;;  %p3909_p2 = scmp.lt.s32.totalorder %s4153_s28, %s4153_s28 }
  0x24   : > { %p3902_p9 = scmp.ne.s32.totalorder %s4153_s28, %s3901_s30  ;;  %p3910_p6 = scmp.lt.s32.totalorder %s3901_s30, %s3901_s30 }
  0x26   : > { %p3904_p10 = pnand %p3902_p9, %p3890_p13  ;;  %p3911_p4 = por %p3910_p6, %p3909_p2 }
  0x28   : > { %p3905_p1 = pneg %p3904_p10 }
  0x2a   : > { %p3912_p8 = pnand %p3911_p4, %p3905_p1 }
  0x2c   : > { %3915 = shalt.err (!%p3912_p8)
}
  0x2d   : > { %s4019_s15 = smov 256   ;;  %s4020_s12 = smov 16  }
  0x2e   : > { %3834 = dma.hbm_to_vmem [thread:$0]  (!%p4160_p11), %s5408_s1, 3072, %s4153_s28, [#allocation6], %s4019_s15, %s4019_s15, %s4020_s12  }
  0x2f   : > { %p37_p2 = scmp.eq.s32.totalorder %s36_s17, 0  ;;  %p46_p1 = scmp.ne.s32.totalorder %s4012_s20, %s4008_s19 }
  0x30   : > { %p47_p4 = scmp.eq.s32.totalorder %s4016_s21, 0  ;;  %p3844_p6 = scmp.lt.s32.totalorder %s4016_s21, 2 }
  0x31   : > { %s4196_s25 = scalar_select %p37_p2, %s4012_s20, %s39_s16  }
  0x32   : > { %p48_p8 = por %p47_p4, %p46_p1  ;;  %p5444_p10 = scmp.eq.s32.totalorder %s4130_s22, 1 }
  0x33   : > { %s448_s23 = sand.u32 1, %s4012_s20   ;;  %s3050_s27 = sshll.u32 %s4016_s21, 9 }
  0x34   : > { %p4200_p12 = por %p5444_p10, %p46_p1  ;;  %s2826_s10 = sshll.u32 %s448_s23, 5 }
  0x35   : > { %s4209_s14 = scalar_lea.hbm %s5407_s0, %s3050_s27  ;;  %s452_s28 = scalar_lea.vmem [#allocation2], %s2826_s10 }
  0x36   : > { %s459_s16 = sshll.u32 %s452_s28, 4  ;;  %p4211_p11 = pnand %p3844_p6, %p48_p8  ;;  %s4215_s16 = int_to_ptr.vmem [resolvable:$true] %s459_s16 }
  0x37   : > { %s4217_s15 = scalar_lea.sflag [#allocation3], %s448_s23  ;;  %s3916_s12 = scalar_lea.hbm %s4209_s14, 512 }
  0x38   : > { %p3917_p13 = scmp.ne.s32.totalorder %s4209_s14, %s3916_s12  ;;  %p3918_p0 = pneg %p4211_p11 }
  0x39   : > { %s3921_s18 = scalar_lea.hbm %s5407_s0, 1024  ;;  %p3922_p7 = scmp.lt.u32.totalorder %s4209_s14, %s5407_s0 }
  0x3a   : > { %p3919_p3 = pnand %p3918_p0, %p3917_p13  ;;  %p3923_p9 = scmp.lt.u32.totalorder %s3921_s18, %s3916_s12 }
  0x3b   : > { %p3925_p1 = scmp.lt.u32.totalorder %s3916_s12, %s4209_s14 }
  0x3c   : > { %p3920_p5 = pneg %p3919_p3  ;;  %p3924_p2 = por %p3923_p9, %p3922_p7 }
  0x3e   : > { %p3926_p4 = por %p3925_p1, %p3924_p2 }
  0x40   : > { %p3927_p6 = pnand %p3926_p4, %p3920_p5 }
  0x42   : > { %3930 = shalt.err (!%p3927_p6)
}
  0x43   : > { %s3931_s23 = scalar_lea.vmem %s4215_s16, 512  ;;  %s4021_s28 = smov [#allocation2]  }
  0x44   : > { %p3932_p8 = scmp.ne.s32.totalorder %s4215_s16, %s3931_s23  ;;  %s3936_s10 = sshll.u32 %s4021_s28, 4  ;;  %s3937_s10 = int_to_ptr.vmem [resolvable:$false] %s3936_s10 }
  0x45   : > { %s3938_s13 = scalar_lea.vmem %s3937_s10, 1024  ;;  %p3939_p3 = scmp.lt.s32.totalorder %s4215_s16, %s3937_s10 }
  0x46   : > { %p3934_p10 = pnand %p3932_p8, %p3918_p0  ;;  %p3940_p7 = scmp.lt.s32.totalorder %s3938_s13, %s3931_s23 }
  0x48   : > { %p3935_p13 = pneg %p3934_p10  ;;  %p3941_p9 = por %p3940_p7, %p3939_p3 }
  0x4a   : > { %p3942_p2 = pnand %p3941_p9, %p3935_p13 }
  0x4c   : > { %3945 = shalt.err (!%p3942_p2)
}
  0x4d   : > { %s4022_s12 = smov 128   ;;  %s4023_s18 = smov 8  }
  0x4e   : > { %3838 = dma.hbm_to_vmem [thread:$0]  (!%p4211_p11), %s4209_s14, 512, %s4215_s16, %s4217_s15, %s4022_s12, %s4022_s12, %s4023_s18  }
  0x4f   : > { %p5447_p0 = scmp.ne.s32.totalorder %s5441_s26, 0 }
  0x50   : > { %s4248_s27 = sand.u32 (!%p5447_p0), 1, %s4008_s19   ;;  %p5448_p5 = scmp.ne.s32.totalorder (!%p5447_p0), %s5438_s24, 0 }
  0x51   : > { %471 = sbr.rel (%p5447_p0) target bundleno = 2260 (0x8d4), region = 80  ;;  %s2830_s29 = sshll.u32 (!%p5447_p0), %s4248_s27, 5 }
  0x52   : > { %s474_s23 = scalar_lea.sflag (!%p5447_p0), [#allocation3], %s4248_s27  ;;  %s4252_s28 = scalar_lea.vmem (!%p5447_p0), [#allocation2], %s2830_s29 }
  0x58   : > { %3991 = dma.done.wait (%p5448_p5), %s474_s23, 512  }
  0x59   : > { %3993 = vsyncadd (%p5448_p5), %s474_s23, 4294966784  ;;  %p5449_p11 = scmp.eq.s32.totalorder %s4130_s22, 0 }
  0x5b   : > { %3995 = dma.done.wait (%p5449_p11), [#allocation6], 3072   ;;  %p5450_p1 = pmov %p5449_p11 }
  0x5c   : > { %v4024_v0 = vmov 0.0   ;;  %v541_v1 = vld [vmem:[#allocation5 + $0x48] sm:$0xff]  ;;  %v543_v2 = vld [vmem:[#allocation5 + $0x58] sm:$0xff]  ;;  %v540_v3 = vld [vmem:[#allocation5 + $0x40] sm:$0xff]  ;;  %vm552_vm0 = vcmask 1046528   ;;  %vm560_vm1 = vcmask 261120  }
  0x5d   : > { %3997 = vsyncadd (%p5450_p1), [#allocation6], 4294964224  ;;  %633 = vmatprep.mubr.f32.mxu0 %v4024_v0  ;;  %984 = vmatprep.mubr.f32.mxu1 %v4024_v0  ;;  %v3377_v4 = vpack.c.bf16 %v543_v2, %v541_v1  ;;  %v542_v5 = vld [vmem:[#allocation5 + $0x50] sm:$0xff]  ;;  %v545_v6 = vld [vmem:[#allocation5 + $0x68] sm:$0xff]  ;;  %vm764_vm2 = vcmask 1045504   ;;  %v4025_v56 = vmov 0.0|0.0  }
  0x5e   : > { %v547_v7 = vld [vmem:[#allocation5 + $0x78] sm:$0xff]  ;;  %v3379_v8 = vpack.c.bf16 %v542_v5, %v540_v3  ;;  %v544_v10 = vld [vmem:[#allocation5 + $0x60] sm:$0xff]  ;;  %v546_v11 = vld [vmem:[#allocation5 + $0x70] sm:$0xff]  ;;  %vm4026_vm3 = vmmov 1   ;;  %vm907_vm5 = vcmask 244736   ;;  %vm1117_vm6 = vcmask 1043456  }
  0x5f   : > { %v3381_v9 = vpack.c.bf16 %v547_v7, %v545_v6  ;;  %v4265_v12 = vld [vmem:[%s4252_s28] sm:$0xff]  ;;  %3378 = vmatprep.subr.bf16.mxu0 %v3377_v4  ;;  %v4268_v13 = vld [vmem:[%s4252_s28 + $0x8] sm:$0xff]  ;;  %v3383_v15 = vpack.c.bf16 %v546_v11, %v544_v10  ;;  %v534_v18 = vld [vmem:[#allocation5 + $0x18] sm:$0xff]  ;;  %vm1110_vm7 = vcmask 424960   ;;  %vm1359_vm8 = vcmask 1041408   ;;  %s5454_s17 = sld [smem:[#allocation14_spill]] }
  0x60   : > { %v532_v14 = vld [vmem:[#allocation5 + $0x8] sm:$0xff]  ;;  %3380 = vmatpush1.bf16.msra.mxu0 %v3379_v8  ;;  %v553_v16 = vrot.slane %v4265_v12, 1  ;;  %v554_v17 = vrot.slane %v4268_v13, 1  ;;  %v4273_v19 = vld [vmem:[%s4252_s28 + $0x10] sm:$0xff]  ;;  %v531_v21 = vld [vmem:[#allocation5] sm:$0xff]  ;;  %v765_v48 = vrot.slane %v4265_v12, 2 }
  0x61   : > { %3382 = vmatprep.subr.bf16.mxu0 %v3381_v9  ;;  %v3385_v20 = vpack.c.bf16 %v534_v18, %v532_v14  ;;  %v533_v22 = vld [vmem:[#allocation5 + $0x10] sm:$0xff]  ;;  %v536_v23 = vld [vmem:[#allocation5 + $0x28] sm:$0xff]  ;;  %v538_v24 = vld [vmem:[#allocation5 + $0x38] sm:$0xff]  ;;  %v556_v26 = vrot.slane %v4273_v19, 1  ;;  %v766_v49 = vrot.slane %v4268_v13, 2  ;;  %v768_v51 = vrot.slane %v4273_v19, 2 }
  0x62   : > { %v555_v25 = vsel %vm552_vm0, %v553_v16, %v554_v17  ;;  %v3387_v27 = vpack.c.bf16 %v533_v22, %v531_v21  ;;  %v530_v28 = vld [vmem:[%s4252_s28 + $0x18] sm:$0xff]  ;;  %v3389_v29 = vpack.c.bf16 %v538_v24, %v536_v23  ;;  %v535_v30 = vld [vmem:[#allocation5 + $0x20] sm:$0xff]  ;;  %v537_v31 = vld [vmem:[#allocation5 + $0x30] sm:$0xff]  ;;  %vm1354_vm10 = vcmask 736256   ;;  %s5453_s28 = sld [smem:[#allocation16_spill]]  ;;  %s5455_s26 = sld [smem:[#allocation15_spill]] }
  0x63   : > { %v757_v32 = vld [vmem:[#allocation5 + $0x88] sm:$0xff]  ;;  %v759_v33 = vld [vmem:[#allocation5 + $0x98] sm:$0xff]  ;;  %v557_v34 = vsel %vm552_vm0, %v554_v17, %v556_v26  ;;  %v558_v35 = vrot.slane %v530_v28, 1  ;;  %v3391_v36 = vpack.c.bf16 %v537_v31, %v535_v30  ;;  %v756_v39 = vld [vmem:[#allocation5 + $0x80] sm:$0xff]  ;;  %v767_v50 = vsel %vm764_vm2, %v765_v48, %v766_v49  ;;  %s3047_s15 = sshll.u32 %s4130_s22, 4  ;;  %s526_s10 = scalar_lea.vmem [#allocation7], %s4248_s27 }
  0x64   : > { %3384 = vmatpush1.bf16.msra.mxu0 %v3383_v15  ;;  %v3393_v37 = vpack.c.bf16 %v759_v33, %v757_v32  ;;  %v758_v40 = vld [vmem:[#allocation5 + $0x90] sm:$0xff]  ;;  %v761_v41 = vld [vmem:[#allocation5 + $0xa8] sm:$0xff]  ;;  %v763_v42 = vld [vmem:[#allocation5 + $0xb8] sm:$0xff]  ;;  %v769_v52 = vsel %vm764_vm2, %v766_v49, %v768_v51  ;;  %v770_v53 = vrot.slane %v530_v28, 2  ;;  %v879_v17 = vlaneseq  ;;  %s2746_s13 = sshll.u32 %s526_s10, 4  ;;  %s5457_s29 = sld [smem:[#allocation18_spill]]  ;;  %s5365_s13 = int_to_ptr.vmem [resolvable:$true] %s2746_s13 }
  0x65   : > { %3386 = vmatprep.subr.bf16.mxu0 %v3385_v20  ;;  %v559_v38 = vsel %vm552_vm0, %v556_v26, %v558_v35  ;;  %v3395_v43 = vpack.c.bf16 %v758_v40, %v756_v39  ;;  %v3397_v44 = vpack.c.bf16 %v763_v42, %v761_v41  ;;  %v760_v45 = vld [vmem:[#allocation5 + $0xa0] sm:$0xff]  ;;  %v762_v46 = vld [vmem:[#allocation5 + $0xb0] sm:$0xff]  ;;  %v2857_v55 = vld [vmem:[%s5411_s4 + $0xb8] sm:$0xff]  ;;  %vm1674_vm11 = vcmask 1044480   ;;  %s2734_s24 = scalar_lea.sflag [#allocation4], %s4248_s27  ;;  %s4028_s22 = smov [#allocation7]  }
  0x66   : > { %v3399_v47 = vpack.c.bf16 %v762_v46, %v760_v45  ;;  %v771_v54 = vsel %vm764_vm2, %v768_v51, %v770_v53  ;;  %v2858_v57 = vld [vmem:[%s5411_s4 + $0xc0] sm:$0xff]  ;;  %v2859_v59 = vld [vmem:[%s5411_s4 + $0xc8] sm:$0xff]  ;;  %v2860_v60 = vld [vmem:[%s5411_s4 + $0xd0] sm:$0xff]  ;;  %v4369_v18 = vshrl.u32 %v879_v17, 7  ;;  %vm1670_vm13 = vcmask 105472   ;;  %s3950_s14 = sshll.u32 %s4028_s22, 4  ;;  %s3951_s14 = int_to_ptr.vmem [resolvable:$false] %s3950_s14 }
  0x67   : > { %2832 = vmatmul.mubr.msk.f32.vlgmr.msra.gmra.mrb[0].mxu0 %vm560_vm1, %v555_v25  ;;  %v3455_v58 = vpack.c.bf16 %v2858_v57, %v2857_v55  ;;  %v3458_v61 = vpack.c.bf16 %v2860_v60, %v2859_v59  ;;  %v2861_v62 = vld [vmem:[%s5411_s4 + $0xd8] sm:$0xff]  ;;  %v2862_v63 = vld [vmem:[%s5411_s4 + $0xe0] sm:$0xff]  ;;  %v2863_v2 = vld [vmem:[%s5411_s4 + $0xe8] sm:$0xff]  ;;  %vm1856_vm14 = vcmask 654336   ;;  %vm4027_vm15 = vmmov 0   ;;  %s3952_s16 = scalar_lea.vmem %s3951_s14, 32  ;;  %p3953_p10 = scmp.lt.s32.totalorder %s5365_s13, %s3951_s14 }
  0x68   : > { %639 = vmatprep.mubr.f32.mxu0 %v4024_v0  ;;  %3388 = vmatpush1.bf16.msra.mxu0 %v3387_v27  ;;  %v3461_v1 = vpack.c.bf16 %v2862_v63, %v2861_v62  ;;  %v2864_v3 = vld [vmem:[%s5411_s4 + $0xf0] sm:$0xff]  ;;  %v2865_v5 = vld [vmem:[%s5411_s4 + $0xf8] sm:$0xff]  ;;  %v2866_v6 = vld [vmem:[%s5411_s4 + $0x100] sm:$0xff]  ;;  %v885_v21 = vsub.s32 1, %v4369_v18 }
  0x69   : > { %3390 = vmatprep.subr.bf16.mxu0 %v3389_v29  ;;  %v3464_v4 = vpack.c.bf16 %v2864_v3, %v2863_v2  ;;  %v3467_v7 = vpack.c.bf16 %v2866_v6, %v2865_v5  ;;  %v2867_v8 = vld [vmem:[%s5411_s4 + $0x108] sm:$0xff]  ;;  %v2868_v9 = vld [vmem:[%s5411_s4 + $0x110] sm:$0xff]  ;;  %v2869_v11 = vld [vmem:[%s5411_s4 + $0x118] sm:$0xff] }
  0x6a   : > { %v3470_v10 = vpack.c.bf16 %v2868_v9, %v2867_v8  ;;  %v2871_v14 = vld [vmem:[%s5411_s4 + $0x128] sm:$0xff]  ;;  %v2872_v15 = vld [vmem:[%s5411_s4 + $0x130] sm:$0xff]  ;;  %v877_v20 = vld [vmem:[%s5409_s2] sm:$0x3]  ;;  %s5363_s23 = scalar_lea.hbm %s5457_s29, %s3047_s15 }
  0x6b   : > { %2833 = vmatmul.mubr.msk.f32.gmra.mrb[2].mxu0 %vm560_vm1, %v557_v34  ;;  %v3476_v16 = vpack.c.bf16 %v2872_v15, %v2871_v14  ;;  %v886_v24 = vrot.slane %v877_v20, %v885_v21  ;;  %vm3406_vm4 = vmpackc.low %vm764_vm2, %vm4026_vm3  ;;  %v1088_v55 = vld [vmem:[%s5411_s4 + $0x8] sm:$0xff]  ;;  %v2848_v57 = vld [vmem:[%s5410_s3 + $0x10] sm:$0xff] }
  0x6c   : > { %645 = vmatprep.mubr.f32.mxu0 %v4024_v0  ;;  %3392 = vmatpush1.bf16.msra.mxu0 %v3391_v36  ;;  %v1089_v59 = vld [vmem:[%s5411_s4 + $0x10] sm:$0xff]  ;;  %v1090_v60 = vld [vmem:[%s5411_s4 + $0x18] sm:$0xff]  ;;  %v1091_v63 = vld [vmem:[%s5411_s4 + $0x20] sm:$0xff] }
  0x6d   : > { %3394 = vmatprep.subr.bf16.mxu0 %v3393_v37  ;;  %v3425_v62 = vpack.c.bf16 %v1090_v60, %v1089_v59  ;;  %v1093_v3 = vld [vmem:[%s5411_s4 + $0x30] sm:$0xff]  ;;  %v1095_v6 = vld [vmem:[%s5411_s4 + $0x40] sm:$0xff]  ;;  %vm4575_vm9 = vmpackc.low %vm1359_vm8, %vm4026_vm3 }
  0x6e   : > { %v1097_v9 = vld [vmem:[%s5411_s4 + $0x50] sm:$0xff]  ;;  %v2887_v59 = vld [vmem:[%s5412_s5 + $0xe0] sm:$0xff]  ;;  %vm3566_vm12 = vmpackc.low %vm1674_vm11, %vm4026_vm3  ;;  %vm2731_vm3 = vcmask 73728  }
  0x6f   : > { %2834 = vmatmul.mubr.msk.f32.gmra.mrb[4].mxu0 %vm560_vm1, %v559_v38  ;;  %v1101_v15 = vld [vmem:[%s5411_s4 + $0x70] sm:$0xff] }
  0x70   : > { %651 = vmatprep.mubr.f32.mxu0 %v4024_v0  ;;  %v2889_v60 = vld [vmem:[%s5412_s5 + $0xf0] sm:$0xff] }
  0x73   : > { %2835 = vmatmul.mubr.msk.f32.gmra.mrb[6].mxu0 %vm560_vm1, %v558_v35 }
  0x74   : > { %730 = vmatprep.mubr.f32.mxu0 %v4024_v0 }
  0x77   : > { %2836 = vmatmul.mubr.msk.f32.vlgmr.msra.gmra.mrb[0].mxu0 %vm560_vm1, %v4265_v12  ;;  %v2870_v12 = vld [vmem:[%s5411_s4 + $0x120] sm:$0xff] }
  0x78   : > { %736 = vmatprep.mubr.f32.mxu0 %v4024_v0  ;;  %3396 = vmatpush1.bf16.msra.mxu0 %v3395_v43 }
  0x79   : > { %3398 = vmatprep.subr.bf16.mxu0 %v3397_v44 }
  0x7b   : > { %2837 = vmatmul.mubr.msk.f32.gmra.mrb[2].mxu0 %vm560_vm1, %v4268_v13  ;;  %v3473_v13 = vpack.c.bf16 %v2870_v12, %v2869_v11  ;;  %v1099_v12 = vld [vmem:[%s5411_s4 + $0x60] sm:$0xff] }
  0x7c   : > { %742 = vmatprep.mubr.f32.mxu0 %v4024_v0  ;;  %3400 = vmatpush1.bf16.msra.mxu0 %v3399_v47 }
  0x7d   : > { %3454 = vmatprep.subr.bf16.mxu0 %v4025_v56 }
  0x7f   : > { %2838 = vmatmul.mubr.msk.f32.gmra.mrb[4].mxu0 %vm560_vm1, %v4273_v19  ;;  %v881_v19 = vsub.s32 0, %v4369_v18  ;;  %v1669_v18 = vld [vmem:[%s5414_s7] sm:$0x3f] }
  0x80   : > { %748 = vmatprep.mubr.f32.mxu0 %v4024_v0 }
  0x81   : > { %v882_v22 = vrot.slane %v877_v20, %v881_v19  ;;  %v1103_v20 = vld [vmem:[%s5411_s4 + $0x80] sm:$0xff] }
  0x83   : > { %2839 = vmatmul.mubr.msk.f32.gmra.mrb[6].mxu0 %vm560_vm1, %v530_v28 }
  0x84   : > { %844 = vmatprep.mubr.f32.mxu0 %v4024_v0 }
  0x87   : > { %2840 = vmatmul.mubr.msk.f32.vlgmr.msra.gmra.mrb[0].mxu0 %vm560_vm1, %v767_v50 }
  0x88   : > { %850 = vmatprep.mubr.f32.mxu0 %v4024_v0  ;;  %3456 = vmatpush1.bf16.msra.mxu0 %v3455_v58 }
  0x89   : > { %3457 = vmatprep.subr.bf16.mxu0 %v4025_v56 }
  0x8b   : > { %2841 = vmatmul.mubr.msk.f32.gmra.mrb[2].mxu0 %vm560_vm1, %v769_v52  ;;  %v905_v52 = vld [vmem:[%s5410_s3] sm:$0xff] }
  0x8c   : > { %856 = vmatprep.mubr.f32.mxu0 %v4024_v0  ;;  %3459 = vmatpush1.bf16.msra.mxu0 %v3458_v61  ;;  %v2849_v61 = vld [vmem:[%s5410_s3 + $0x18] sm:$0x7f] }
  0x8d   : > { %3460 = vmatprep.subr.bf16.mxu0 %v4025_v56 }
  0x8f   : > { %2842 = vmatmul.mubr.msk.f32.gmra.mrb[4].mxu0 %vm560_vm1, %v771_v54  ;;  %v1087_v54 = vld [vmem:[%s5411_s4] sm:$0xff] }
  0x90   : > { %862 = vmatprep.mubr.f32.mxu0 %v4024_v0  ;;  %3462 = vmatpush1.bf16.msra.mxu0 %v3461_v1  ;;  %v3422_v58 = vpack.c.bf16 %v1088_v55, %v1087_v54  ;;  %v1092_v1 = vld [vmem:[%s5411_s4 + $0x28] sm:$0xff] }
  0x91   : > { %3463 = vmatprep.subr.bf16.mxu0 %v4025_v56  ;;  %v3428_v2 = vpack.c.bf16 %v1092_v1, %v1091_v63  ;;  %v2894_v63 = vld [vmem:[%s5412_s5 + $0x118] sm:$0xff] }
  0x93   : > { %2843 = vmatmul.mubr.msk.f32.gmra.mrb[6].mxu0 %vm560_vm1, %v770_v53  ;;  %v906_v53 = vld [vmem:[%s5410_s3 + $0x8] sm:$0x7f]  ;;  %vm2567_vm1 = vcmask 982016  }
  0x94   : > { %3465 = vmatpush1.bf16.msra.mxu0 %v3464_v4  ;;  %v1094_v4 = vld [vmem:[%s5411_s4 + $0x38] sm:$0xff] }
  0x95   : > { %3466 = vmatprep.subr.bf16.mxu0 %v4025_v56  ;;  %v3431_v5 = vpack.c.bf16 %v1094_v4, %v1093_v3  ;;  %v3493_v4 = vpack.c.bf16 %v2889_v60, %v2887_v59  ;;  %v1311_v59 = vld [vmem:[%s5412_s5 + $0x58] sm:$0xff] }
  0x98   : > { %3468 = vmatpush1.bf16.msra.mxu0 %v3467_v7  ;;  %v1096_v7 = vld [vmem:[%s5411_s4 + $0x48] sm:$0xff] }
  0x99   : > { %3469 = vmatprep.subr.bf16.mxu0 %v4025_v56  ;;  %v3434_v8 = vpack.c.bf16 %v1096_v7, %v1095_v6  ;;  %v2891_v6 = vld [vmem:[%s5412_s5 + $0x100] sm:$0xff]  ;;  %v2893_v7 = vld [vmem:[%s5412_s5 + $0x110] sm:$0xff] }
  0x9c   : > { %3471 = vmatpush1.bf16.msra.mxu0 %v3470_v10  ;;  %v1098_v10 = vld [vmem:[%s5411_s4 + $0x58] sm:$0xff] }
  0x9d   : > { %3472 = vmatprep.subr.bf16.mxu0 %v4025_v56  ;;  %v3437_v11 = vpack.c.bf16 %v1098_v10, %v1097_v9  ;;  %v2898_v9 = vld [vmem:[%s5412_s5 + $0x138] sm:$0xff]  ;;  %v3497_v10 = vpack.c.bf16 %v2893_v7, %v2891_v6  ;;  %v1312_v6 = vld [vmem:[%s5412_s5 + $0x60] sm:$0xff]  ;;  %v1314_v7 = vld [vmem:[%s5412_s5 + $0x70] sm:$0xff] }
  0xa0   : > { %3474 = vmatpush1.bf16.msra.mxu0 %v3473_v13  ;;  %v1100_v13 = vld [vmem:[%s5411_s4 + $0x68] sm:$0xff] }
  0xa1   : > { %3475 = vmatprep.subr.bf16.mxu0 %v4025_v56  ;;  %v3440_v14 = vpack.c.bf16 %v1100_v13, %v1099_v12  ;;  %v2895_v12 = vld [vmem:[%s5412_s5 + $0x120] sm:$0xff]  ;;  %v2897_v13 = vld [vmem:[%s5412_s5 + $0x130] sm:$0xff] }
  0xa4   : > { %3477 = vmatpush1.bf16.msra.mxu0 %v3476_v16  ;;  %v1102_v16 = vld [vmem:[%s5411_s4 + $0x78] sm:$0xff] }
  0xa5   : > { %3478 = vmatprep.subr.bf16.mxu0 %v4025_v56  ;;  %v3443_v17 = vpack.c.bf16 %v1102_v16, %v1101_v15  ;;  %v2900_v15 = vld [vmem:[%s5412_s5 + $0x148] sm:$0xff]  ;;  %v2902_v16 = vld [vmem:[%s5412_s5 + $0x158] sm:$0xff] }
 0x15a   : > { %v846_v23 = vpop.f32.mrb[0].mxu0 }
 0x15b   : > { %v848_v25 = vpop.f32.mrb[1].mxu0  ;;  %v889_v26 = vadd.f32 %v882_v22, %v846_v23  ;;  %v2873_v23 = vld [vmem:[%s5411_s4 + $0x138] sm:$0xff] }
 0x15c   : > { %v890_v27 = vadd.f32 %v886_v24, %v848_v25  ;;  %v2874_v25 = vld [vmem:[%s5411_s4 + $0x140] sm:$0xff] }
 0x15d   : > { %v897_v32 = vmax.f32 %v889_v26, 0.0  ;;  %v3479_v26 = vpack.c.bf16 %v2874_v25, %v2873_v23  ;;  %v2904_v25 = vld [vmem:[%s5412_s5 + $0x168] sm:$0xff] }
 0x15e   : > { %v852_v28 = vpop.f32.mrb[2].mxu0  ;;  %v898_v34 = vmax.f32 %v890_v27, 0.0  ;;  %v1105_v27 = vld [vmem:[%s5411_s4 + $0x90] sm:$0xff] }
 0x15f   : > { %v891_v29 = vadd.f32 %v882_v22, %v852_v28  ;;  %v854_v30 = vpop.f32.mrb[3].mxu0  ;;  %3480 = vmatpush1.bf16.msra.mxu0 %v3479_v26  ;;  %v1106_v28 = vld [vmem:[%s5411_s4 + $0x98] sm:$0xff] }
 0x160   : > { %v892_v31 = vadd.f32 %v886_v24, %v854_v30  ;;  %3481 = vmatprep.subr.bf16.mxu0 %v4025_v56  ;;  %v3449_v30 = vpack.c.bf16 %v1106_v28, %v1105_v27  ;;  %v2906_v26 = vld [vmem:[%s5412_s5 + $0x178] sm:$0x3]  ;;  %v2903_v28 = vld [vmem:[%s5412_s5 + $0x160] sm:$0xff] }
 0x161   : > { %v899_v33 = vmax.f32 %v891_v29, 0.0  ;;  %v2875_v29 = vld [vmem:[%s5411_s4 + $0x148] sm:$0xff]  ;;  %v3507_v27 = vpack.c.bf16 %v2906_v26, %v2904_v25  ;;  %v2918_v25 = vld [vmem:[%s5412_s5 + $0x198] sm:$0xff] }
 0x162   : > { %v900_v35 = vmax.f32 %v892_v31, 0.0  ;;  %v858_v36 = vpop.f32.mrb[4].mxu0  ;;  %v2876_v31 = vld [vmem:[%s5411_s4 + $0x150] sm:$0xff] }
 0x163   : > { %v860_v37 = vpop.f32.mrb[5].mxu0  ;;  %v3403_v38 = vpack.c.bf16 %v899_v33, %v897_v32  ;;  %v893_v40 = vadd.f32 %v882_v22, %v858_v36  ;;  %v3482_v32 = vpack.c.bf16 %v2876_v31, %v2875_v29  ;;  %v1107_v33 = vld [vmem:[%s5411_s4 + $0xa0] sm:$0xff]  ;;  %v2905_v29 = vld [vmem:[%s5412_s5 + $0x170] sm:$0x3]  ;;  %v1301_v31 = vld [vmem:[%s5412_s5 + $0x8] sm:$0xff] }
 0x164   : > { %v3401_v39 = vpack.c.bf16 %v900_v35, %v898_v34  ;;  %v894_v41 = vadd.f32 %v886_v24, %v860_v37  ;;  %v1108_v34 = vld [vmem:[%s5411_s4 + $0xa8] sm:$0xff]  ;;  %v2877_v35 = vld [vmem:[%s5411_s4 + $0x158] sm:$0xff]  ;;  %v2878_v37 = vld [vmem:[%s5411_s4 + $0x160] sm:$0xff] }
 0x165   : > { %v901_v46 = vmax.f32 %v893_v40, 0.0  ;;  %3483 = vmatpush1.bf16.msra.mxu0 %v3482_v32  ;;  %v3452_v36 = vpack.c.bf16 %v1108_v34, %v1107_v33  ;;  %v2879_v40 = vld [vmem:[%s5411_s4 + $0x168] sm:$0xf]  ;;  %v1303_v32 = vld [vmem:[%s5412_s5 + $0x18] sm:$0xff] }
 0x166   : > { %v864_v42 = vpop.f32.mrb[6].mxu0  ;;  %3402 = vmatprep.subr.bf16.mxu1 %v3401_v39  ;;  %v902_v48 = vmax.f32 %v894_v41, 0.0  ;;  %3484 = vmatprep.subr.bf16.mxu0 %v4025_v56  ;;  %v2884_v41 = vld [vmem:[%s5412_s5 + $0xc8] sm:$0xff]  ;;  %v3513_v33 = vpack.c.bf16 %v1303_v32, %v1301_v31  ;;  %v2922_v31 = vld [vmem:[%s5412_s5 + $0x1b8] sm:$0xff] }
 0x167   : > { %v895_v43 = vadd.f32 %v882_v22, %v864_v42  ;;  %v866_v44 = vpop.f32.mrb[7].mxu0  ;;  %3404 = vmatpush1.bf16.msra.mxu1 %v3403_v38  ;;  %v1104_v22 = vld [vmem:[%s5411_s4 + $0x88] sm:$0xff]  ;;  %v2886_v42 = vld [vmem:[%s5412_s5 + $0xd8] sm:$0xff] }
 0x168   : > { %v896_v45 = vadd.f32 %v886_v24, %v866_v44  ;;  %v3446_v24 = vpack.c.bf16 %v1104_v22, %v1103_v20  ;;  %v2899_v20 = vld [vmem:[%s5412_s5 + $0x140] sm:$0xff]  ;;  %v2901_v22 = vld [vmem:[%s5412_s5 + $0x150] sm:$0xff] }
 0x169   : > { %v903_v47 = vmax.f32 %v895_v43, 0.0  ;;  %v3487_v43 = vpack.c.bf16 %v2886_v42, %v2884_v41  ;;  %v3505_v23 = vpack.c.bf16 %v2901_v22, %v2899_v20  ;;  %v1320_v20 = vld [vmem:[%s5412_s5 + $0xa0] sm:$0xff]  ;;  %v1322_v22 = vld [vmem:[%s5412_s5 + $0xb0] sm:$0x3] }
 0x16a   : > { %v904_v49 = vmax.f32 %v896_v45, 0.0  ;;  %v3536_v26 = vpack.c.bf16 %v1322_v22, %v1320_v20  ;;  %v2965_v22 = vld [vmem:[%s5415_s8 + $0x140] sm:$0xff] }
 0x16b   : > { %v3408_v50 = vpack.c.bf16 %v903_v47, %v901_v46 }
 0x16c   : > { %v3405_v51 = vpack.c.bf16 %v904_v49, %v902_v48  ;;  %v2883_v48 = vld [vmem:[%s5412_s5 + $0xc0] sm:$0xff]  ;;  %v2885_v49 = vld [vmem:[%s5412_s5 + $0xd0] sm:$0xff] }
 0x16e   : > { %3407 = vmatprep.subr.msk.bf16.mxu1 %vm3406_vm4, %v3405_v51 }
 0x16f   : > { %3410 = vmatpush1.bf16.msk.msra.mxu1 %vm3406_vm4, %v3408_v50 }
 0x170   : > { %3412 = vmatprep.subr.bf16.mxu1 %v3401_v39  ;;  %v1109_v39 = vld [vmem:[%s5411_s4 + $0xb0] sm:$0xf] }
 0x172   : > { %2846 = vmatmul.mubr.msk.f32.vlgmr.msra.gmra.mrb[0].mxu1 %vm907_vm5, %v905_v52  ;;  %v2890_v52 = vld [vmem:[%s5412_s5 + $0xf8] sm:$0xff] }
 0x173   : > { %3414 = vmatpush1.bf16.msra.mxu1 %v3403_v38  ;;  %990 = vmatprep.mubr.f32.mxu1 %v4024_v0  ;;  %v3485_v38 = vpack.c.bf16 %v2878_v37, %v2877_v35 }
 0x174   : > { %3417 = vmatprep.subr.msk.bf16.mxu1 %vm3406_vm4, %v3405_v51  ;;  %v2888_v51 = vld [vmem:[%s5412_s5 + $0xe8] sm:$0xff] }
 0x175   : > { %3486 = vmatpush1.bf16.msra.mxu0 %v3485_v38 }
 0x176   : > { %2847 = vmatmul.mubr.msk.f32.gmra.mrb[2].mxu1 %vm907_vm5, %v906_v53  ;;  %1267 = vmatprep.subr.mxu0 %v4024_v0 }
 0x177   : > { %3420 = vmatpush1.bf16.msk.msra.mxu1 %vm3406_vm4, %v3408_v50  ;;  %1070 = vmatprep.mubr.f32.mxu1 %v4024_v0 }
 0x178   : > { %3421 = vmatprep.subr.bf16.mxu1 %v4025_v56 }
 0x179   : > { %2880 = vmatpush1.msk.msra.mxu0 %vm1117_vm6, %v2879_v40  ;;  %v1302_v40 = vld [vmem:[%s5412_s5 + $0x10] sm:$0xff] }
 0x17a   : > { %2852 = vmatmul.mubr.msk.f32.vlgmr.msra.gmra.mrb[4].mxu1 %vm907_vm5, %v2848_v57  ;;  %v3489_v57 = vpack.c.bf16 %v2885_v49, %v2883_v48 }
 0x17b   : > { %1076 = vmatprep.mubr.f32.mxu1 %v4024_v0  ;;  %3423 = vmatpush1.bf16.msra.mxu1 %v3422_v58  ;;  %v3491_v58 = vpack.c.bf16 %v2890_v52, %v2888_v51 }
 0x17c   : > { %3424 = vmatprep.subr.bf16.mxu1 %v4025_v56 }
 0x17e   : > { %2853 = vmatmul.mubr.msk.f32.gmra.mrb[6].mxu1 %vm907_vm5, %v2849_v61 }
 0x17f   : > { %3426 = vmatpush1.bf16.msra.mxu1 %v3425_v62  ;;  %v2892_v62 = vld [vmem:[%s5412_s5 + $0x108] sm:$0xff] }
 0x180   : > { %3427 = vmatprep.subr.bf16.mxu1 %v4025_v56 }
 0x183   : > { %3429 = vmatpush1.bf16.msra.mxu1 %v3428_v2 }
 0x184   : > { %3430 = vmatprep.subr.bf16.mxu1 %v4025_v56 }
 0x187   : > { %3432 = vmatpush1.bf16.msra.mxu1 %v3431_v5  ;;  %v3495_v5 = vpack.c.bf16 %v2894_v63, %v2892_v62  ;;  %v1308_v63 = vld [vmem:[%s5412_s5 + $0x40] sm:$0xff] }
 0x188   : > { %3433 = vmatprep.subr.bf16.mxu1 %v4025_v56 }
 0x18b   : > { %3435 = vmatpush1.bf16.msra.mxu1 %v3434_v8  ;;  %v2896_v8 = vld [vmem:[%s5412_s5 + $0x128] sm:$0xff] }
 0x18c   : > { %3436 = vmatprep.subr.bf16.mxu1 %v4025_v56 }
 0x18f   : > { %3438 = vmatpush1.bf16.msra.mxu1 %v3437_v11  ;;  %v3499_v11 = vpack.c.bf16 %v2898_v9, %v2896_v8  ;;  %v1317_v8 = vld [vmem:[%s5412_s5 + $0x88] sm:$0xff]  ;;  %v1319_v9 = vld [vmem:[%s5412_s5 + $0x98] sm:$0xff] }
 0x190   : > { %3439 = vmatprep.subr.bf16.mxu1 %v4025_v56 }
 0x193   : > { %3441 = vmatpush1.bf16.msra.mxu1 %v3440_v14  ;;  %v3501_v14 = vpack.c.bf16 %v2897_v13, %v2895_v12  ;;  %v1316_v12 = vld [vmem:[%s5412_s5 + $0x80] sm:$0xff]  ;;  %v1318_v13 = vld [vmem:[%s5412_s5 + $0x90] sm:$0xff] }
 0x194   : > { %3442 = vmatprep.subr.bf16.mxu1 %v4025_v56 }
 0x197   : > { %3444 = vmatpush1.bf16.msra.mxu1 %v3443_v17  ;;  %v3503_v17 = vpack.c.bf16 %v2902_v16, %v2900_v15  ;;  %v1323_v15 = vld [vmem:[%s5412_s5 + $0xb8] sm:$0x3]  ;;  %v3531_v16 = vpack.c.bf16 %v1318_v13, %v1316_v12  ;;  %v2961_v13 = vld [vmem:[%s5415_s8 + $0x120] sm:$0xff] }
 0x198   : > { %3445 = vmatprep.subr.bf16.mxu1 %v4025_v56 }
 0x19b   : > { %3447 = vmatpush1.bf16.msra.mxu1 %v3446_v24  ;;  %v2952_v24 = vld [vmem:[%s5415_s8 + $0xd8] sm:$0xff] }
 0x19c   : > { %3448 = vmatprep.subr.bf16.mxu1 %v4025_v56 }
 0x19f   : > { %3450 = vmatpush1.bf16.msra.mxu1 %v3449_v30  ;;  %v3510_v30 = vpack.c.bf16 %v2905_v29, %v2903_v28  ;;  %v2915_v28 = vld [vmem:[%s5412_s5 + $0x180] sm:$0xff]  ;;  %v2917_v29 = vld [vmem:[%s5412_s5 + $0x190] sm:$0xff] }
 0x1a0   : > { %3451 = vmatprep.subr.bf16.mxu1 %v4025_v56  ;;  %v3541_v32 = vpack.c.bf16 %v2917_v29, %v2915_v28  ;;  %v2969_v29 = vld [vmem:[%s5415_s8 + $0x160] sm:$0xff] }
 0x1a3   : > { %3453 = vmatpush1.bf16.msra.mxu1 %v3452_v36 }
 0x1a4   : > { %1165 = vmatprep.subr.mxu1 %v4024_v0 }
 0x1a7   : > { %2854 = vmatpush1.msk.msra.mxu1 %vm1117_vm6, %v1109_v39  ;;  %v1300_v39 = vld [vmem:[%s5412_s5] sm:$0xff] }
 0x1a8   : > { %3488 = vmatprep.subr.bf16.mxu1 %v3487_v43  ;;  %v3515_v48 = vpack.c.bf16 %v1302_v40, %v1300_v39 }
 0x245   : > { %v986_v44 = vpop.f32.mrb[0].mxu1 }
 0x246   : > { %v988_v45 = vpop.f32.mrb[1].mxu1 }
 0x249   : > { %v992_v46 = vpop.f32.mrb[2].mxu1 }
 0x24a   : > { %v994_v47 = vpop.f32.mrb[3].mxu1 }
 0x24d   : > { %v1072_v50 = vpop.f32.mrb[4].mxu1 }
 0x24e   : > { %v1083_v53 = vmax.f32 %v986_v44, %v1072_v50  ;;  %v1074_v54 = vpop.f32.mrb[5].mxu1 }
 0x24f   : > { %v1084_v55 = vmax.f32 %v988_v45, %v1074_v54  ;;  %v1304_v54 = vld [vmem:[%s5412_s5 + $0x20] sm:$0xff] }
 0x251   : > { %v1078_v61 = vpop.f32.mrb[6].mxu1  ;;  %2855 = vmatprep.mubr.msk.f32.mxu1 %vm1110_vm7, %v1084_v55  ;;  %2881 = vmatprep.mubr.msk.f32.mxu0 %vm1110_vm7, %v1084_v55  ;;  %v1306_v55 = vld [vmem:[%s5412_s5 + $0x30] sm:$0xff] }
 0x252   : > { %v1085_v1 = vmax.f32 %v992_v46, %v1078_v61  ;;  %v1080_v2 = vpop.f32.mrb[7].mxu1  ;;  %1186 = vmatmul.mubr.f32.vlgmr.msra.gmra.mrb[8].mxu1 %v1083_v53  ;;  %1288 = vmatmul.mubr.f32.vlgmr.msra.gmra.mrb[8].mxu0 %v1083_v53  ;;  %v1305_v46 = vld [vmem:[%s5412_s5 + $0x28] sm:$0xff]  ;;  %v3519_v61 = vpack.c.bf16 %v1306_v55, %v1304_v54  ;;  %v2931_v54 = vld [vmem:[%s5412_s5 + $0x200] sm:$0xff]  ;;  %v2933_v55 = vld [vmem:[%s5412_s5 + $0x210] sm:$0xff] }
 0x253   : > { %v1086_v3 = vmax.f32 %v994_v47, %v1080_v2  ;;  %3490 = vmatpush1.bf16.msra.mxu1 %v3489_v57  ;;  %v1307_v47 = vld [vmem:[%s5412_s5 + $0x38] sm:$0xff]  ;;  %v1313_v2 = vld [vmem:[%s5412_s5 + $0x68] sm:$0xff] }
 0x254   : > { %3492 = vmatprep.subr.bf16.mxu1 %v3491_v58  ;;  %v3517_v53 = vpack.c.bf16 %v1307_v47, %v1305_v46  ;;  %v1309_v58 = vld [vmem:[%s5412_s5 + $0x48] sm:$0xff]  ;;  %v2927_v47 = vld [vmem:[%s5412_s5 + $0x1e0] sm:$0xff] }
 0x255   : > { %2856 = vmatprep.mubr.msk.f32.mxu1 %vm1110_vm7, %v1086_v3  ;;  %2882 = vmatprep.mubr.msk.f32.mxu0 %vm1110_vm7, %v1086_v3  ;;  %v3521_v62 = vpack.c.bf16 %v1311_v59, %v1309_v58  ;;  %v1315_v3 = vld [vmem:[%s5412_s5 + $0x78] sm:$0xff]  ;;  %v3557_v59 = vpack.c.bf16 %v2933_v55, %v2931_v54  ;;  %v2946_v54 = vld [vmem:[%s5414_s7 + $0x8] sm:$0x3f] }
 0x256   : > { %1191 = vmatmul.mubr.f32.gmra.mrb[10].mxu1 %v1085_v1  ;;  %1293 = vmatmul.mubr.f32.gmra.mrb[10].mxu0 %v1085_v1  ;;  %v1310_v1 = vld [vmem:[%s5412_s5 + $0x50] sm:$0xff]  ;;  %v2938_v58 = vld [vmem:[%s5412_s5 + $0x238] sm:$0x3] }
 0x257   : > { %3494 = vmatpush1.bf16.msra.mxu1 %v3493_v4  ;;  %1430 = vmatprep.mubr.f32.mxu1 %v4024_v0  ;;  %v3523_v4 = vpack.c.bf16 %v1310_v1, %v1308_v63  ;;  %v2937_v63 = vld [vmem:[%s5412_s5 + $0x230] sm:$0x3] }
 0x258   : > { %3496 = vmatprep.subr.bf16.mxu1 %v3495_v5  ;;  %1745 = vmatprep.mubr.f32.mxu0 %v4024_v0  ;;  %v3525_v5 = vpack.c.bf16 %v1315_v3, %v1313_v2  ;;  %v2951_v2 = vld [vmem:[%s5415_s8 + $0xd0] sm:$0xff] }
 0x259   : > { %v3617_v3 = vpack.c.bf16 %v2952_v24, %v2951_v2  ;;  %v1837_v2 = vld [vmem:[%s5415_s8 + $0x38] sm:$0xff] }
 0x25b   : > { %3498 = vmatpush1.bf16.msra.mxu1 %v3497_v10  ;;  %v3527_v10 = vpack.c.bf16 %v1314_v7, %v1312_v6  ;;  %v2957_v7 = vld [vmem:[%s5415_s8 + $0x100] sm:$0xff] }
 0x25c   : > { %3500 = vmatprep.subr.bf16.mxu1 %v3499_v11  ;;  %v3529_v11 = vpack.c.bf16 %v1319_v9, %v1317_v8  ;;  %v2958_v8 = vld [vmem:[%s5415_s8 + $0x108] sm:$0xff] }
 0x25d   : > { %v3626_v9 = vpack.c.bf16 %v2958_v8, %v2957_v7  ;;  %v1843_v7 = vld [vmem:[%s5415_s8 + $0x68] sm:$0xff] }
 0x25f   : > { %3502 = vmatpush1.bf16.msra.mxu1 %v3501_v14  ;;  %v1321_v14 = vld [vmem:[%s5412_s5 + $0xa8] sm:$0xff] }
 0x260   : > { %3504 = vmatprep.subr.bf16.mxu1 %v3503_v17  ;;  %v3533_v17 = vpack.c.bf16 %v1323_v15, %v1321_v14  ;;  %v2962_v14 = vld [vmem:[%s5415_s8 + $0x128] sm:$0xff] }
 0x261   : > { %v3632_v15 = vpack.c.bf16 %v2962_v14, %v2961_v13  ;;  %v1847_v13 = vld [vmem:[%s5415_s8 + $0x88] sm:$0xff] }
 0x263   : > { %3506 = vmatpush1.bf16.msra.mxu1 %v3505_v23  ;;  %v2916_v23 = vld [vmem:[%s5412_s5 + $0x188] sm:$0xff] }
 0x264   : > { %3509 = vmatprep.subr.msk.bf16.mxu1 %vm4575_vm9, %v3507_v27  ;;  %v3539_v27 = vpack.c.bf16 %v2918_v25, %v2916_v23  ;;  %v2966_v23 = vld [vmem:[%s5415_s8 + $0x148] sm:$0xff] }
 0x265   : > { %v3638_v25 = vpack.c.bf16 %v2966_v23, %v2965_v22  ;;  %v1851_v22 = vld [vmem:[%s5415_s8 + $0xa8] sm:$0xff] }
 0x267   : > { %3512 = vmatpush1.bf16.msk.msra.mxu1 %vm4575_vm9, %v3510_v30  ;;  %v2920_v30 = vld [vmem:[%s5412_s5 + $0x1a8] sm:$0xff] }
 0x268   : > { %3514 = vmatprep.subr.bf16.mxu1 %v3513_v33  ;;  %v3543_v33 = vpack.c.bf16 %v2922_v31, %v2920_v30  ;;  %v2970_v30 = vld [vmem:[%s5415_s8 + $0x168] sm:$0xff] }
 0x269   : > { %v3644_v31 = vpack.c.bf16 %v2970_v30, %v2969_v29  ;;  %v2974_v29 = vld [vmem:[%s5415_s8 + $0x188] sm:$0xff] }
 0x325   : > { %v1187_v34 = vpop.f32.mrb[8].mxu1  ;;  %v1289_v35 = vpop.f32.mrb[8].mxu0 }
 0x326   : > { %v4601_v36 = vmax.f32 %v1187_v34, %v1289_v35  ;;  %v1189_v37 = vpop.f32.mrb[9].mxu1  ;;  %v1291_v38 = vpop.f32.mrb[9].mxu0  ;;  %v2919_v34 = vld [vmem:[%s5412_s5 + $0x1a0] sm:$0xff]  ;;  %v2921_v35 = vld [vmem:[%s5412_s5 + $0x1b0] sm:$0xff] }
 0x327   : > { %v2924_v37 = vld [vmem:[%s5412_s5 + $0x1c8] sm:$0xff]  ;;  %v2926_v38 = vld [vmem:[%s5412_s5 + $0x1d8] sm:$0xff]  ;;  %v3545_v39 = vpack.c.bf16 %v2921_v35, %v2919_v34  ;;  %v1649_v35 = vld [vmem:[%s5413_s6] sm:$0x3] }
 0x328   : > { %v1351_v49 = vrot.slane %v4601_v36, 1  ;;  %v1555_v50 = vrot.slane %v4601_v36, 2  ;;  %v3547_v40 = vpack.c.bf16 %v2926_v38, %v2924_v37  ;;  %v1654_v37 = vrot.slane %v1649_v35, %v881_v19 }
 0x329   : > { %v1192_v41 = vpop.f32.mrb[10].mxu1  ;;  %v1294_v42 = vpop.f32.mrb[10].mxu0 }
 0x32a   : > { %v4609_v43 = vmax.f32 %v1192_v41, %v1294_v42  ;;  %v1194_v44 = vpop.f32.mrb[11].mxu1  ;;  %v1296_v45 = vpop.f32.mrb[11].mxu0  ;;  %v2923_v41 = vld [vmem:[%s5412_s5 + $0x1c0] sm:$0xff]  ;;  %v2925_v42 = vld [vmem:[%s5412_s5 + $0x1d0] sm:$0xff] }
 0x32b   : > { %v2928_v44 = vld [vmem:[%s5412_s5 + $0x1e8] sm:$0xff]  ;;  %v3549_v45 = vpack.c.bf16 %v2925_v42, %v2923_v41 }
 0x32c   : > { %v1352_v51 = vrot.slane %v4609_v43, 1  ;;  %v1556_v52 = vrot.slane %v4609_v43, 2 }
 0x32e   : > { %v1353_v57 = vsel %vm552_vm0, %v1351_v49, %v1352_v51  ;;  %v4637_v60 = vsel %vm764_vm2, %v1555_v50, %v1556_v52  ;;  %v2932_v49 = vld [vmem:[%s5412_s5 + $0x208] sm:$0xff]  ;;  %v2934_v50 = vld [vmem:[%s5412_s5 + $0x218] sm:$0xff]  ;;  %vm2055_vm0 = vcmask 785408   ;;  %vm2654_vm2 = vcmask 687104  }
 0x32f   : > { %2909 = vmatmul.mubr.msk.f32.vlgmr.msra.gmra.mrb[12].mxu1 %vm1354_vm10, %v1353_v57  ;;  %v2936_v57 = vld [vmem:[%s5412_s5 + $0x228] sm:$0xff] }
 0x330   : > { %3516 = vmatpush1.bf16.msra.mxu1 %v3515_v48  ;;  %1436 = vmatprep.mubr.f32.mxu1 %v4024_v0  ;;  %v2929_v48 = vld [vmem:[%s5412_s5 + $0x1f0] sm:$0xff] }
 0x331   : > { %3518 = vmatprep.subr.bf16.mxu1 %v3517_v53  ;;  %v3555_v53 = vpack.c.bf16 %v2934_v50, %v2932_v49 }
 0x333   : > { %2910 = vmatmul.mubr.msk.f32.gmra.mrb[14].mxu1 %vm1354_vm10, %v1352_v51  ;;  %v3553_v51 = vpack.c.bf16 %v2929_v48, %v2927_v47 }
 0x334   : > { %3520 = vmatpush1.bf16.msra.mxu1 %v3519_v61  ;;  %1517 = vmatprep.mubr.f32.mxu1 %v4024_v0  ;;  %v3559_v61 = vpack.c.bf16 %v2938_v58, %v2936_v57  ;;  %v1832_v57 = vld [vmem:[%s5415_s8 + $0x10] sm:$0xff]  ;;  %v1833_v58 = vld [vmem:[%s5415_s8 + $0x18] sm:$0xff] }
 0x335   : > { %3522 = vmatprep.subr.bf16.mxu1 %v3521_v62  ;;  %v2935_v62 = vld [vmem:[%s5412_s5 + $0x220] sm:$0xff] }
 0x336   : > { %v3562_v1 = vpack.c.bf16 %v2937_v63, %v2935_v62  ;;  %v1835_v62 = vld [vmem:[%s5415_s8 + $0x28] sm:$0xff] }
 0x338   : > { %3524 = vmatpush1.bf16.msra.mxu1 %v3523_v4  ;;  %v2955_v4 = vld [vmem:[%s5415_s8 + $0xf0] sm:$0xff] }
 0x339   : > { %3526 = vmatprep.subr.bf16.mxu1 %v3525_v5  ;;  %v2956_v5 = vld [vmem:[%s5415_s8 + $0xf8] sm:$0xff] }
 0x33a   : > { %v3623_v6 = vpack.c.bf16 %v2956_v5, %v2955_v4  ;;  %v1841_v4 = vld [vmem:[%s5415_s8 + $0x58] sm:$0xff] }
 0x33c   : > { %3528 = vmatpush1.bf16.msra.mxu1 %v3527_v10  ;;  %v2959_v10 = vld [vmem:[%s5415_s8 + $0x110] sm:$0xff] }
 0x33d   : > { %3530 = vmatprep.subr.bf16.mxu1 %v3529_v11  ;;  %v2960_v11 = vld [vmem:[%s5415_s8 + $0x118] sm:$0xff] }
 0x33e   : > { %v3629_v12 = vpack.c.bf16 %v2960_v11, %v2959_v10  ;;  %v1845_v10 = vld [vmem:[%s5415_s8 + $0x78] sm:$0xff] }
 0x340   : > { %3532 = vmatpush1.bf16.msra.mxu1 %v3531_v16  ;;  %v2963_v16 = vld [vmem:[%s5415_s8 + $0x130] sm:$0xff] }
 0x341   : > { %3535 = vmatprep.subr.msk.bf16.mxu1 %vm4575_vm9, %v3533_v17  ;;  %v2964_v17 = vld [vmem:[%s5415_s8 + $0x138] sm:$0xff] }
 0x342   : > { %v3635_v20 = vpack.c.bf16 %v2964_v17, %v2963_v16  ;;  %v1849_v16 = vld [vmem:[%s5415_s8 + $0x98] sm:$0xff] }
 0x344   : > { %3538 = vmatpush1.bf16.msk.msra.mxu1 %vm4575_vm9, %v3536_v26  ;;  %v2967_v26 = vld [vmem:[%s5415_s8 + $0x150] sm:$0xff] }
 0x345   : > { %3540 = vmatprep.subr.bf16.mxu1 %v3539_v27  ;;  %v2968_v27 = vld [vmem:[%s5415_s8 + $0x158] sm:$0xff] }
 0x346   : > { %v3641_v28 = vpack.c.bf16 %v2968_v27, %v2967_v26  ;;  %v1853_v26 = vld [vmem:[%s5415_s8 + $0xb8] sm:$0xff]  ;;  %v2973_v27 = vld [vmem:[%s5415_s8 + $0x180] sm:$0xff] }
 0x347   : > { %2913 = vmatmul.mubr.msk.f32.vlgmr.msra.gmra.mrb[12].mxu1 %vm1354_vm10, %v4601_v36  ;;  %v2930_v36 = vld [vmem:[%s5412_s5 + $0x1f8] sm:$0xff]  ;;  %v3650_v30 = vpack.c.bf16 %v2974_v29, %v2973_v27 }
 0x348   : > { %3542 = vmatpush1.bf16.msra.mxu1 %v3541_v32  ;;  %1523 = vmatprep.mubr.f32.mxu1 %v4024_v0  ;;  %v3551_v46 = vpack.c.bf16 %v2930_v36, %v2928_v44  ;;  %v2971_v32 = vld [vmem:[%s5415_s8 + $0x170] sm:$0xff] }
 0x349   : > { %3544 = vmatprep.subr.bf16.mxu1 %v3543_v33  ;;  %v2972_v33 = vld [vmem:[%s5415_s8 + $0x178] sm:$0xff] }
 0x34a   : > { %v3647_v34 = vpack.c.bf16 %v2972_v33, %v2971_v32  ;;  %v1855_v32 = vld [vmem:[%s5415_s8 + $0xc8] sm:$0xff]  ;;  %v2975_v33 = vld [vmem:[%s5415_s8 + $0x190] sm:$0xff] }
 0x34b   : > { %2914 = vmatmul.mubr.msk.f32.gmra.mrb[14].mxu1 %vm1354_vm10, %v4609_v43  ;;  %v2954_v43 = vld [vmem:[%s5415_s8 + $0xe8] sm:$0xff] }
 0x34c   : > { %3546 = vmatpush1.bf16.msra.mxu1 %v3545_v39  ;;  %1632 = vmatprep.mubr.f32.mxu1 %v4024_v0  ;;  %v1658_v39 = vrot.slane %v1649_v35, %v885_v21  ;;  %v1830_v21 = vld [vmem:[%s5415_s8] sm:$0xff]  ;;  %v2976_v35 = vld [vmem:[%s5415_s8 + $0x198] sm:$0xff] }
 0x34d   : > { %3548 = vmatprep.subr.bf16.mxu1 %v3547_v40 }
 0x350   : > { %3550 = vmatpush1.bf16.msra.mxu1 %v3549_v45 }
 0x351   : > { %3552 = vmatprep.subr.bf16.mxu1 %v3551_v46 }
 0x354   : > { %3554 = vmatpush1.bf16.msra.mxu1 %v3553_v51 }
 0x355   : > { %3556 = vmatprep.subr.bf16.mxu1 %v3555_v53  ;;  %v1831_v53 = vld [vmem:[%s5415_s8 + $0x8] sm:$0xff] }
 0x356   : > { %v3578_v55 = vpack.c.bf16 %v1831_v53, %v1830_v21 }
 0x358   : > { %3558 = vmatpush1.bf16.msra.mxu1 %v3557_v59  ;;  %v3581_v59 = vpack.c.bf16 %v1833_v58, %v1832_v57  ;;  %v2996_v57 = vld [vmem:[%s5416_s9 + $0xe0] sm:$0xff]  ;;  %v2997_v58 = vld [vmem:[%s5416_s9 + $0xe8] sm:$0xff] }
 0x359   : > { %3561 = vmatprep.subr.msk.bf16.mxu1 %vm4575_vm9, %v3559_v61  ;;  %v1834_v61 = vld [vmem:[%s5415_s8 + $0x20] sm:$0xff] }
 0x35a   : > { %v3584_v63 = vpack.c.bf16 %v1835_v62, %v1834_v61  ;;  %v3698_v61 = vpack.c.bf16 %v2997_v58, %v2996_v57  ;;  %v2984_v62 = vld [vmem:[%s5416_s9 + $0x90] sm:$0xff]  ;;  %v3029_v57 = vld [vmem:[%s5416_s9 + $0x1d8] sm:$0xff] }
 0x35c   : > { %3564 = vmatpush1.bf16.msk.msra.mxu1 %vm4575_vm9, %v3562_v1  ;;  %v1836_v1 = vld [vmem:[%s5415_s8 + $0x30] sm:$0xff] }
 0x35d   : > { %3616 = vmatprep.subr.bf16.mxu1 %v4025_v56  ;;  %v3587_v24 = vpack.c.bf16 %v1837_v2, %v1836_v1  ;;  %v2998_v1 = vld [vmem:[%s5416_s9 + $0xf0] sm:$0xff]  ;;  %v2999_v2 = vld [vmem:[%s5416_s9 + $0xf8] sm:$0xff] }
 0x35f   : > { %2941 = vmatmul.mubr.msk.f32.vlgmr.msra.gmra.mrb[12].mxu1 %vm1354_vm10, %v4637_v60  ;;  %v2953_v60 = vld [vmem:[%s5415_s8 + $0xe0] sm:$0xff] }
 0x360   : > { %1638 = vmatprep.mubr.f32.mxu1 %v4024_v0  ;;  %3618 = vmatpush1.bf16.msra.mxu1 %v3617_v3  ;;  %v1838_v3 = vld [vmem:[%s5415_s8 + $0x40] sm:$0xff] }
 0x361   : > { %3619 = vmatprep.subr.bf16.mxu1 %v4025_v56 }
 0x363   : > { %2942 = vmatmul.mubr.msk.f32.gmra.mrb[14].mxu1 %vm1354_vm10, %v1556_v52  ;;  %v3620_v52 = vpack.c.bf16 %v2954_v43, %v2953_v60  ;;  %v1839_v60 = vld [vmem:[%s5415_s8 + $0x48] sm:$0xff] }
 0x364   : > { %v3590_v43 = vpack.c.bf16 %v1839_v60, %v1838_v3  ;;  %v3701_v3 = vpack.c.bf16 %v2999_v2, %v2998_v1  ;;  %v2986_v60 = vld [vmem:[%s5416_s9 + $0xa0] sm:$0xff]  ;;  %v3007_v2 = vld [vmem:[%s5416_s9 + $0x130] sm:$0xff] }
 0x365   : > { %3621 = vmatpush1.bf16.msra.mxu1 %v3620_v52  ;;  %v1840_v52 = vld [vmem:[%s5415_s8 + $0x50] sm:$0xff] }
 0x366   : > { %3622 = vmatprep.subr.bf16.mxu1 %v4025_v56  ;;  %v3593_v5 = vpack.c.bf16 %v1841_v4, %v1840_v52  ;;  %v3000_v52 = vld [vmem:[%s5416_s9 + $0x100] sm:$0xff]  ;;  %v3001_v4 = vld [vmem:[%s5416_s9 + $0x108] sm:$0xff] }
 0x369   : > { %3624 = vmatpush1.bf16.msra.mxu1 %v3623_v6  ;;  %v1842_v6 = vld [vmem:[%s5415_s8 + $0x60] sm:$0xff] }
 0x36a   : > { %3625 = vmatprep.subr.bf16.mxu1 %v4025_v56  ;;  %v3596_v8 = vpack.c.bf16 %v1843_v7, %v1842_v6  ;;  %v3704_v6 = vpack.c.bf16 %v3001_v4, %v3000_v52  ;;  %v2988_v7 = vld [vmem:[%s5416_s9 + $0xb0] sm:$0xff] }
 0x36b   : > { %v3011_v4 = vld [vmem:[%s5416_s9 + $0x150] sm:$0xff] }
 0x36d   : > { %3627 = vmatpush1.bf16.msra.mxu1 %v3626_v9  ;;  %v1844_v9 = vld [vmem:[%s5415_s8 + $0x70] sm:$0xff] }
 0x36e   : > { %3628 = vmatprep.subr.bf16.mxu1 %v4025_v56  ;;  %v3599_v11 = vpack.c.bf16 %v1845_v10, %v1844_v9  ;;  %v3002_v9 = vld [vmem:[%s5416_s9 + $0x110] sm:$0xff] }
 0x371   : > { %3630 = vmatpush1.bf16.msra.mxu1 %v3629_v12  ;;  %v1846_v12 = vld [vmem:[%s5415_s8 + $0x80] sm:$0xff] }
 0x372   : > { %3631 = vmatprep.subr.bf16.mxu1 %v4025_v56  ;;  %v3602_v14 = vpack.c.bf16 %v1847_v13, %v1846_v12  ;;  %v2028_v13 = vld [vmem:[%s5416_s9] sm:$0xff] }
 0x375   : > { %3633 = vmatpush1.bf16.msra.mxu1 %v3632_v15  ;;  %v1848_v15 = vld [vmem:[%s5415_s8 + $0x90] sm:$0xff] }
 0x376   : > { %3634 = vmatprep.subr.bf16.mxu1 %v4025_v56  ;;  %v3605_v17 = vpack.c.bf16 %v1849_v16, %v1848_v15  ;;  %v3018_v15 = vld [vmem:[%s5416_s9 + $0x180] sm:$0xff]  ;;  %v3019_v16 = vld [vmem:[%s5416_s9 + $0x188] sm:$0xff] }
 0x377   : > { %v3728_v27 = vpack.c.bf16 %v3019_v16, %v3018_v15 }
 0x379   : > { %3636 = vmatpush1.bf16.msra.mxu1 %v3635_v20  ;;  %v1850_v20 = vld [vmem:[%s5415_s8 + $0xa0] sm:$0xff] }
 0x37a   : > { %3637 = vmatprep.subr.bf16.mxu1 %v4025_v56  ;;  %v3608_v23 = vpack.c.bf16 %v1851_v22, %v1850_v20 }
 0x37d   : > { %3639 = vmatpush1.bf16.msra.mxu1 %v3638_v25  ;;  %v1852_v25 = vld [vmem:[%s5415_s8 + $0xb0] sm:$0xff] }
 0x37e   : > { %3640 = vmatprep.subr.bf16.mxu1 %v4025_v56 }
 0x381   : > { %3642 = vmatpush1.bf16.msra.mxu1 %v3641_v28  ;;  %v3611_v28 = vpack.c.bf16 %v1853_v26, %v1852_v25 }
 0x382   : > { %3643 = vmatprep.subr.bf16.mxu1 %v4025_v56 }
 0x385   : > { %3645 = vmatpush1.bf16.msra.mxu1 %v3644_v31  ;;  %v1854_v31 = vld [vmem:[%s5415_s8 + $0xc0] sm:$0xff] }
 0x386   : > { %3646 = vmatprep.subr.bf16.mxu1 %v4025_v56 }
 0x389   : > { %3648 = vmatpush1.bf16.msra.mxu1 %v3647_v34  ;;  %v3614_v34 = vpack.c.bf16 %v1855_v32, %v1854_v31  ;;  %v2031_v31 = vld [vmem:[%s5416_s9 + $0x18] sm:$0xff]  ;;  %v3020_v32 = vld [vmem:[%s5416_s9 + $0x190] sm:$0xff] }
 0x38a   : > { %3649 = vmatprep.subr.bf16.mxu1 %v4025_v56 }
 0x38d   : > { %3651 = vmatpush1.bf16.msra.mxu1 %v3650_v30 }
 0x38e   : > { %3652 = vmatprep.subr.bf16.mxu1 %v4025_v56 }
 0x432   : > { %v1634_v38 = vpop.f32.mrb[12].mxu1 }
 0x433   : > { %v1636_v40 = vpop.f32.mrb[13].mxu1  ;;  %v1661_v41 = vadd.f32 %v1654_v37, %v1634_v38 }
 0x434   : > { %v1662_v42 = vadd.f32 %v1658_v39, %v1636_v40  ;;  %v2978_v40 = vld [vmem:[%s5416_s9 + $0x60] sm:$0xff] }
 0x435   : > { %v1665_v47 = vmax.f32 %v1661_v41, 0.0  ;;  %v2979_v41 = vld [vmem:[%s5416_s9 + $0x68] sm:$0xff] }
 0x436   : > { %v1640_v44 = vpop.f32.mrb[14].mxu1  ;;  %v1666_v49 = vmax.f32 %v1662_v42, 0.0  ;;  %v2992_v42 = vld [vmem:[%s5416_s9 + $0xc0] sm:$0xff] }
 0x437   : > { %v1663_v36 = vadd.f32 %v1654_v37, %v1640_v44  ;;  %v1642_v45 = vpop.f32.mrb[15].mxu1  ;;  %v3653_v37 = vpack.c.bf16 %v2976_v35, %v2975_v33  ;;  %v2993_v44 = vld [vmem:[%s5416_s9 + $0xc8] sm:$0xff]  ;;  %v3021_v33 = vld [vmem:[%s5416_s9 + $0x198] sm:$0xff] }
 0x438   : > { %v1664_v46 = vadd.f32 %v1658_v39, %v1642_v45  ;;  %v3731_v35 = vpack.c.bf16 %v3021_v33, %v3020_v32  ;;  %v3040_v32 = vld [vmem:[%s5416_s9 + $0x228] sm:$0xff] }
 0x439   : > { %v1667_v48 = vmax.f32 %v1663_v36, 0.0  ;;  %3654 = vmatpush1.bf16.msra.mxu1 %v3653_v37  ;;  %v2032_v37 = vld [vmem:[%s5416_s9 + $0x20] sm:$0xff] }
 0x43a   : > { %v1668_v50 = vmax.f32 %v1664_v46, 0.0  ;;  %3691 = vmatprep.subr.bf16.mxu1 %v4025_v56 }
 0x43b   : > { %v3568_v51 = vpack.c.bf16 %v1667_v48, %v1665_v47  ;;  %v3656_v48 = vpack.c.bf16 %v2979_v41, %v2978_v40  ;;  %v3023_v40 = vld [vmem:[%s5416_s9 + $0x1a8] sm:$0xff] }
 0x43c   : > { %v3565_v19 = vpack.c.bf16 %v1668_v50, %v1666_v49  ;;  %v3692_v49 = vpack.c.bf16 %v2993_v44, %v2992_v42  ;;  %v2980_v50 = vld [vmem:[%s5416_s9 + $0x70] sm:$0xff] }
 0x43d   : > { %v2034_v44 = vld [vmem:[%s5416_s9 + $0x30] sm:$0xff] }
 0x43e   : > { %3567 = vmatprep.subr.msk.bf16.mxu0 %vm3566_vm12, %v3565_v19 }
 0x43f   : > { %3570 = vmatpush1.bf16.msk.msra.mxu0 %vm3566_vm12, %v3568_v51 }
 0x440   : > { %3573 = vmatprep.subr.msk.bf16.mxu0 %vm3566_vm12, %v3565_v19  ;;  %v2994_v19 = vld [vmem:[%s5416_s9 + $0xd0] sm:$0xff] }
 0x442   : > { %2945 = vmatmul.mubr.msk.f32.vlgmr.msra.gmra.mrb[12].mxu0 %vm1670_vm13, %v1669_v18  ;;  %v2995_v18 = vld [vmem:[%s5416_s9 + $0xd8] sm:$0xff] }
 0x443   : > { %3576 = vmatpush1.bf16.msk.msra.mxu0 %vm3566_vm12, %v3568_v51  ;;  %1821 = vmatprep.mubr.f32.mxu0 %v4024_v0  ;;  %v2981_v51 = vld [vmem:[%s5416_s9 + $0x78] sm:$0xff]  ;;  %v3695_v53 = vpack.c.bf16 %v2995_v18, %v2994_v19  ;;  %v3027_v19 = vld [vmem:[%s5416_s9 + $0x1c8] sm:$0xff] }
 0x444   : > { %3577 = vmatprep.subr.bf16.mxu0 %v4025_v56  ;;  %v3659_v21 = vpack.c.bf16 %v2981_v51, %v2980_v50  ;;  %v2037_v50 = vld [vmem:[%s5416_s9 + $0x48] sm:$0xff]  ;;  %v3026_v51 = vld [vmem:[%s5416_s9 + $0x1c0] sm:$0xff] }
 0x446   : > { %2949 = vmatmul.mubr.msk.f32.vlgmr.msra.gmra.mrb[14].mxu0 %vm1670_vm13, %v2946_v54  ;;  %v2982_v54 = vld [vmem:[%s5416_s9 + $0x80] sm:$0xff] }
 0x447   : > { %3579 = vmatpush1.bf16.msra.mxu0 %v3578_v55  ;;  %v2983_v55 = vld [vmem:[%s5416_s9 + $0x88] sm:$0xff] }
 0x448   : > { %3580 = vmatprep.subr.bf16.mxu0 %v4025_v56 }
 0x44b   : > { %3582 = vmatpush1.bf16.msra.mxu0 %v3581_v59  ;;  %v3662_v59 = vpack.c.bf16 %v2983_v55, %v2982_v54  ;;  %v2039_v54 = vld [vmem:[%s5416_s9 + $0x58] sm:$0xff]  ;;  %v3028_v55 = vld [vmem:[%s5416_s9 + $0x1d0] sm:$0xff] }
 0x44c   : > { %3583 = vmatprep.subr.bf16.mxu0 %v4025_v56 }
 0x44f   : > { %3585 = vmatpush1.bf16.msra.mxu0 %v3584_v63  ;;  %v2985_v63 = vld [vmem:[%s5416_s9 + $0x98] sm:$0xff] }
 0x450   : > { %3586 = vmatprep.subr.bf16.mxu0 %v4025_v56 }
 0x453   : > { %3588 = vmatpush1.bf16.msra.mxu0 %v3587_v24  ;;  %v3665_v24 = vpack.c.bf16 %v2985_v63, %v2984_v62  ;;  %v3006_v62 = vld [vmem:[%s5416_s9 + $0x128] sm:$0xff] }
 0x454   : > { %3589 = vmatprep.subr.bf16.mxu0 %v4025_v56 }
 0x457   : > { %3591 = vmatpush1.bf16.msra.mxu0 %v3590_v43  ;;  %v2987_v43 = vld [vmem:[%s5416_s9 + $0xa8] sm:$0xff] }
 0x458   : > { %3592 = vmatprep.subr.bf16.mxu0 %v4025_v56 }
 0x45b   : > { %3594 = vmatpush1.bf16.msra.mxu0 %v3593_v5  ;;  %v3668_v5 = vpack.c.bf16 %v2987_v43, %v2986_v60  ;;  %v3009_v60 = vld [vmem:[%s5416_s9 + $0x140] sm:$0xff]  ;;  %v3010_v43 = vld [vmem:[%s5416_s9 + $0x148] sm:$0xff] }
 0x45c   : > { %3595 = vmatprep.subr.bf16.mxu0 %v4025_v56  ;;  %v3716_v52 = vpack.c.bf16 %v3010_v43, %v3009_v60  ;;  %v2648_v43 = vld [vmem:[%s5453_s28 + $0x30] sm:$0xff] }
 0x45f   : > { %3597 = vmatpush1.bf16.msra.mxu0 %v3596_v8  ;;  %v2989_v8 = vld [vmem:[%s5416_s9 + $0xb8] sm:$0xff] }
 0x460   : > { %3598 = vmatprep.subr.bf16.mxu0 %v4025_v56  ;;  %v3671_v10 = vpack.c.bf16 %v2989_v8, %v2988_v7  ;;  %v3013_v7 = vld [vmem:[%s5416_s9 + $0x160] sm:$0xff]  ;;  %v3014_v8 = vld [vmem:[%s5416_s9 + $0x168] sm:$0xff] }
 0x463   : > { %3600 = vmatpush1.bf16.msra.mxu0 %v3599_v11  ;;  %v3003_v11 = vld [vmem:[%s5416_s9 + $0x118] sm:$0xff] }
 0x464   : > { %3601 = vmatprep.subr.bf16.mxu0 %v4025_v56  ;;  %v3707_v12 = vpack.c.bf16 %v3003_v11, %v3002_v9  ;;  %v3722_v9 = vpack.c.bf16 %v3014_v8, %v3013_v7  ;;  %v3016_v11 = vld [vmem:[%s5416_s9 + $0x178] sm:$0xff] }
 0x467   : > { %3603 = vmatpush1.bf16.msra.mxu0 %v3602_v14  ;;  %v2029_v14 = vld [vmem:[%s5416_s9 + $0x8] sm:$0xff] }
 0x468   : > { %3604 = vmatprep.subr.bf16.mxu0 %v4025_v56  ;;  %v3674_v26 = vpack.c.bf16 %v2029_v14, %v2028_v13  ;;  %v3031_v13 = vld [vmem:[%s5416_s9 + $0x1e0] sm:$0xff]  ;;  %v3032_v14 = vld [vmem:[%s5416_s9 + $0x1e8] sm:$0xff] }
 0x469   : > { %v3746_v15 = vpack.c.bf16 %v3032_v14, %v3031_v13 }
 0x46b   : > { %3606 = vmatpush1.bf16.msra.mxu0 %v3605_v17 }
 0x46c   : > { %3607 = vmatprep.subr.bf16.mxu0 %v4025_v56 }
 0x46f   : > { %3609 = vmatpush1.bf16.msra.mxu0 %v3608_v23 }
 0x470   : > { %3610 = vmatprep.subr.bf16.mxu0 %v4025_v56 }
 0x473   : > { %3612 = vmatpush1.bf16.msra.mxu0 %v3611_v28  ;;  %v2030_v28 = vld [vmem:[%s5416_s9 + $0x10] sm:$0xff] }
 0x474   : > { %3613 = vmatprep.subr.bf16.mxu0 %v4025_v56 }
 0x477   : > { %3615 = vmatpush1.bf16.msra.mxu0 %v3614_v34  ;;  %v3677_v34 = vpack.c.bf16 %v2031_v31, %v2030_v28  ;;  %v3037_v28 = vld [vmem:[%s5416_s9 + $0x210] sm:$0xff]  ;;  %v3039_v31 = vld [vmem:[%s5416_s9 + $0x220] sm:$0xff] }
 0x478   : > { %3655 = vmatprep.subr.bf16.mxu0 %v4025_v56  ;;  %v3758_v33 = vpack.c.bf16 %v3040_v32, %v3039_v31  ;;  %v2652_v32 = vld [vmem:[%s5453_s28 + $0x50] sm:$0xf] }
 0x515   : > { %v1747_v38 = vpop.f32.mrb[12].mxu0 }
 0x516   : > { %v1749_v39 = vpop.f32.mrb[13].mxu0 }
 0x519   : > { %v1823_v36 = vpop.f32.mrb[14].mxu0 }
 0x51a   : > { %v1828_v45 = vmax.f32 %v1747_v38, %v1823_v36  ;;  %v1825_v46 = vpop.f32.mrb[15].mxu0  ;;  %v2033_v38 = vld [vmem:[%s5416_s9 + $0x28] sm:$0xff]  ;;  %v2035_v36 = vld [vmem:[%s5416_s9 + $0x38] sm:$0xff] }
 0x51b   : > { %v1829_v47 = vmax.f32 %v1749_v39, %v1825_v46  ;;  %v3022_v39 = vld [vmem:[%s5416_s9 + $0x1a0] sm:$0xff]  ;;  %v3680_v41 = vpack.c.bf16 %v2033_v38, %v2032_v37  ;;  %v3025_v46 = vld [vmem:[%s5416_s9 + $0x1b8] sm:$0xff] }
 0x51c   : > { %v3734_v42 = vpack.c.bf16 %v3023_v40, %v3022_v39  ;;  %v2551_v39 = vld [vmem:[%s5418_s11] sm:$0xff]  ;;  %v2552_v40 = vld [vmem:[%s5418_s11 + $0x8] sm:$0xff] }
 0x51d   : > { %2950 = vmatprep.mubr.msk.f32.mxu0 %vm1856_vm14, %v1829_v47  ;;  %2977 = vmatprep.mubr.msk.f32.mxu1 %vm1856_vm14, %v1829_v47  ;;  %v3683_v47 = vpack.c.bf16 %v2035_v36, %v2034_v44  ;;  %v2555_v36 = vld [vmem:[%s5418_s11 + $0x20] sm:$0xff] }
 0x51e   : > { %1925 = vmatmul.mubr.f32.vlgmr.msra.gmra.mrb[16].mxu0 %v1828_v45  ;;  %2022 = vmatmul.mubr.f32.vlgmr.msra.gmra.mrb[16].mxu1 %v1828_v45  ;;  %v3024_v45 = vld [vmem:[%s5416_s9 + $0x1b0] sm:$0xff] }
 0x51f   : > { %3657 = vmatpush3.bf16.msra.mxu0 %v3656_v48  ;;  %3693 = vmatpush3.bf16.msra.mxu1 %v3692_v49  ;;  %v3737_v48 = vpack.c.bf16 %v3025_v46, %v3024_v45  ;;  %v2036_v49 = vld [vmem:[%s5416_s9 + $0x40] sm:$0xff]  ;;  %v2556_v45 = vld [vmem:[%s5418_s11 + $0x28] sm:$0xff] }
 0x520   : > { %3658 = vmatprep.subr.bf16.mxu0 %v4025_v56  ;;  %3694 = vmatprep.subr.bf16.mxu1 %v4025_v56  ;;  %v3686_v18 = vpack.c.bf16 %v2037_v50, %v2036_v49  ;;  %v3770_v46 = vpack.c.bf16 %v2556_v45, %v2555_v36  ;;  %v2559_v50 = vld [vmem:[%s5418_s11 + $0x40] sm:$0xff] }
 0x521   : > { %3181 = vmatprep.mubr.msk.f32.mxu0 %vm4027_vm15, %v4024_v0  ;;  %3235 = vmatprep.mubr.msk.f32.mxu1 %vm4027_vm15, %v4024_v0 }
 0x523   : > { %3660 = vmatpush3.bf16.msra.mxu0 %v3659_v21  ;;  %3696 = vmatpush3.bf16.msra.mxu1 %v3695_v53  ;;  %v3740_v21 = vpack.c.bf16 %v3027_v19, %v3026_v51  ;;  %v2038_v53 = vld [vmem:[%s5416_s9 + $0x50] sm:$0xff]  ;;  %v2560_v51 = vld [vmem:[%s5418_s11 + $0x48] sm:$0xff] }
 0x524   : > { %3661 = vmatprep.subr.bf16.mxu0 %v4025_v56  ;;  %3697 = vmatprep.subr.bf16.mxu1 %v4025_v56  ;;  %v3689_v58 = vpack.c.bf16 %v2039_v54, %v2038_v53  ;;  %v3776_v19 = vpack.c.bf16 %v2560_v51, %v2559_v50  ;;  %v2563_v54 = vld [vmem:[%s5418_s11 + $0x60] sm:$0xff] }
 0x527   : > { %3663 = vmatpush3.bf16.msra.mxu0 %v3662_v59  ;;  %3699 = vmatpush3.bf16.msra.mxu1 %v3698_v61  ;;  %v3743_v59 = vpack.c.bf16 %v3029_v57, %v3028_v55  ;;  %v3005_v61 = vld [vmem:[%s5416_s9 + $0x120] sm:$0xff]  ;;  %v2564_v55 = vld [vmem:[%s5418_s11 + $0x68] sm:$0xff] }
 0x528   : > { %3664 = vmatprep.subr.bf16.mxu0 %v4025_v56  ;;  %3700 = vmatprep.subr.bf16.mxu1 %v4025_v56  ;;  %v3710_v63 = vpack.c.bf16 %v3006_v62, %v3005_v61  ;;  %v3782_v57 = vpack.c.bf16 %v2564_v55, %v2563_v54  ;;  %v2643_v61 = vld [vmem:[%s5453_s28 + $0x8] sm:$0xff]  ;;  %v2644_v62 = vld [vmem:[%s5453_s28 + $0x10] sm:$0xff] }
 0x52b   : > { %3666 = vmatpush3.bf16.msra.mxu0 %v3665_v24  ;;  %3702 = vmatpush3.bf16.msra.mxu1 %v3701_v3  ;;  %v3008_v24 = vld [vmem:[%s5416_s9 + $0x138] sm:$0xff] }
 0x52c   : > { %3667 = vmatprep.subr.bf16.mxu0 %v4025_v56  ;;  %3703 = vmatprep.subr.bf16.mxu1 %v4025_v56  ;;  %v3713_v3 = vpack.c.bf16 %v3008_v24, %v3007_v2  ;;  %v2646_v24 = vld [vmem:[%s5453_s28 + $0x20] sm:$0xff] }
 0x52f   : > { %3669 = vmatpush3.bf16.msra.mxu0 %v3668_v5  ;;  %3705 = vmatpush3.bf16.msra.mxu1 %v3704_v6  ;;  %v3012_v5 = vld [vmem:[%s5416_s9 + $0x158] sm:$0xff] }
 0x530   : > { %3670 = vmatprep.subr.bf16.mxu0 %v4025_v56  ;;  %3706 = vmatprep.subr.bf16.mxu1 %v4025_v56  ;;  %v3719_v6 = vpack.c.bf16 %v3012_v5, %v3011_v4 }
 0x533   : > { %3672 = vmatpush3.bf16.msra.mxu0 %v3671_v10  ;;  %3708 = vmatpush3.bf16.msra.mxu1 %v3707_v12  ;;  %v3015_v10 = vld [vmem:[%s5416_s9 + $0x170] sm:$0xff] }
 0x534   : > { %3673 = vmatprep.subr.bf16.mxu0 %v4025_v56  ;;  %3727 = vmatprep.subr.bf16.mxu1 %v4025_v56  ;;  %v3725_v12 = vpack.c.bf16 %v3016_v11, %v3015_v10 }
 0x5f1   : > { %v1926_v17 = vpop.f32.mrb[16].mxu0  ;;  %v2023_v20 = vpop.f32.mrb[16].mxu1 }
 0x5f2   : > { %v5076_v22 = vmax.f32 %v1926_v17, %v2023_v20  ;;  %v1928_v23 = vpop.f32.mrb[17].mxu0  ;;  %v2025_v25 = vpop.f32.mrb[17].mxu1  ;;  %v3033_v17 = vld [vmem:[%s5416_s9 + $0x1f0] sm:$0xff]  ;;  %v3034_v20 = vld [vmem:[%s5416_s9 + $0x1f8] sm:$0xff] }
 0x5f3   : > { %v3749_v23 = vpack.c.bf16 %v3034_v20, %v3033_v17  ;;  %v3035_v25 = vld [vmem:[%s5416_s9 + $0x200] sm:$0xff] }
 0x5f4   : > { %v2054_v29 = vrot.slane %v5076_v22, 1  ;;  %v2213_v30 = vrot.slane %v5076_v22, 2  ;;  %v2387_v1 = vrot.slane %v5076_v22, 4  ;;  %v2300_v16 = vrot.slane %v5076_v22, 3 }
 0x5f5   : > { %v2474_v38 = vrot.slane %v5076_v22, 5 }
 0x5f6   : > { %3182 = vmatmul.mubr.msk.f32.vlgmr.msra.gmra.mrb[18].mxu0 %vm2055_vm0, %v2054_v29  ;;  %3236 = vmatmul.mubr.msk.f32.vlgmr.msra.gmra.mrb[18].mxu1 %vm2055_vm0, %v2213_v30  ;;  %v3038_v29 = vld [vmem:[%s5416_s9 + $0x218] sm:$0xff] }
 0x5f7   : > { %3675 = vmatpush3.bf16.msra.mxu0 %v3674_v26  ;;  %3729 = vmatpush3.bf16.msra.mxu1 %v3728_v27  ;;  %v3036_v26 = vld [vmem:[%s5416_s9 + $0x208] sm:$0xff]  ;;  %v3755_v30 = vpack.c.bf16 %v3038_v29, %v3037_v28  ;;  %v2650_v29 = vld [vmem:[%s5453_s28 + $0x40] sm:$0xff] }
 0x5f8   : > { %3676 = vmatprep.subr.bf16.mxu0 %v4025_v56  ;;  %3730 = vmatprep.subr.bf16.mxu1 %v4025_v56  ;;  %v3752_v27 = vpack.c.bf16 %v3036_v26, %v3035_v25  ;;  %v2548_v25 = vld [vmem:[%s5454_s17] sm:$0x1]  ;;  %s5456_s17 = sld [smem:[#allocation17_spill]] }
 0x5f9   : > { %3208 = vmatprep.mubr.msk.f32.mxu0 %vm4027_vm15, %v4024_v0  ;;  %3289 = vmatprep.mubr.msk.f32.mxu1 %vm4027_vm15, %v4024_v0 }
 0x5fb   : > { %3678 = vmatpush3.bf16.msra.mxu0 %v3677_v34  ;;  %3732 = vmatpush3.bf16.msra.mxu1 %v3731_v35  ;;  %v3041_v34 = vld [vmem:[%s5416_s9 + $0x230] sm:$0xff]  ;;  %v3042_v35 = vld [vmem:[%s5416_s9 + $0x238] sm:$0xff] }
 0x5fc   : > { %3679 = vmatprep.subr.bf16.mxu0 %v4025_v56  ;;  %3733 = vmatprep.subr.bf16.mxu1 %v4025_v56  ;;  %v3761_v37 = vpack.c.bf16 %v3042_v35, %v3041_v34 }
 0x5ff   : > { %3681 = vmatpush3.bf16.msra.mxu0 %v3680_v41  ;;  %3735 = vmatpush3.bf16.msra.mxu1 %v3734_v42  ;;  %v3764_v41 = vpack.c.bf16 %v2552_v40, %v2551_v39  ;;  %v2554_v42 = vld [vmem:[%s5418_s11 + $0x18] sm:$0xff] }
 0x600   : > { %3682 = vmatprep.subr.bf16.mxu0 %v4025_v56  ;;  %3736 = vmatprep.subr.bf16.mxu1 %v4025_v56 }
 0x603   : > { %3684 = vmatpush3.bf16.msra.mxu0 %v3683_v47  ;;  %3738 = vmatpush3.bf16.msra.mxu1 %v3737_v48  ;;  %v2557_v47 = vld [vmem:[%s5418_s11 + $0x30] sm:$0xff]  ;;  %v2558_v48 = vld [vmem:[%s5418_s11 + $0x38] sm:$0xff] }
 0x604   : > { %3685 = vmatprep.subr.bf16.mxu0 %v4025_v56  ;;  %3739 = vmatprep.subr.bf16.mxu1 %v4025_v56  ;;  %v3773_v49 = vpack.c.bf16 %v2558_v48, %v2557_v47 }
 0x607   : > { %3687 = vmatpush3.bf16.msra.mxu0 %v3686_v18  ;;  %3741 = vmatpush3.bf16.msra.mxu1 %v3740_v21  ;;  %v2561_v18 = vld [vmem:[%s5418_s11 + $0x50] sm:$0xff]  ;;  %v2562_v21 = vld [vmem:[%s5418_s11 + $0x58] sm:$0xff] }
 0x608   : > { %3688 = vmatprep.subr.bf16.mxu0 %v4025_v56  ;;  %3742 = vmatprep.subr.bf16.mxu1 %v4025_v56  ;;  %v3779_v53 = vpack.c.bf16 %v2562_v21, %v2561_v18 }
 0x60b   : > { %3690 = vmatpush3.bf16.msra.mxu0 %v3689_v58  ;;  %3744 = vmatpush3.bf16.msra.mxu1 %v3743_v59  ;;  %v2565_v58 = vld [vmem:[%s5418_s11 + $0x70] sm:$0xff]  ;;  %v2642_v59 = vld [vmem:[%s5453_s28] sm:$0xff] }
 0x60c   : > { %3709 = vmatprep.subr.bf16.mxu0 %v4025_v56  ;;  %3763 = vmatprep.subr.bf16.mxu1 %v4025_v56 }
 0x60e   : > { %3209 = vmatmul.mubr.msk.f32.vlgmr.msra.gmra.mrb[20].mxu0 %vm2055_vm0, %v5076_v22  ;;  %3290 = vmatmul.mubr.msk.f32.vlgmr.msra.gmra.mrb[20].mxu1 %vm2055_vm0, %v2387_v1  ;;  %v2553_v22 = vld [vmem:[%s5418_s11 + $0x10] sm:$0xff]  ;;  %v2645_v1 = vld [vmem:[%s5453_s28 + $0x18] sm:$0xff] }
 0x60f   : > { %3711 = vmatpush3.bf16.msra.mxu0 %v3710_v63  ;;  %3262 = vmatprep.mubr.msk.f32.mxu0 %vm4027_vm15, %v4024_v0  ;;  %v3767_v44 = vpack.c.bf16 %v2554_v42, %v2553_v22  ;;  %v3785_v63 = vpack.c.bf16 %v2643_v61, %v2642_v59  ;;  %v3788_v2 = vpack.c.bf16 %v2645_v1, %v2644_v62 }
 0x610   : > { %3712 = vmatprep.subr.bf16.mxu0 %v4025_v56  ;;  %3349 = vmatprep.mubr.msk.f32.mxu1 %vm4027_vm15, %v4024_v0 }
 0x611   : > { %3765 = vmatpush3.bf16.msra.mxu1 %v3764_v41 }
 0x612   : > { %3766 = vmatprep.subr.bf16.mxu1 %v4025_v56 }
 0x613   : > { %3714 = vmatpush3.bf16.msra.mxu0 %v3713_v3  ;;  %v2647_v3 = vld [vmem:[%s5453_s28 + $0x28] sm:$0xff] }
 0x614   : > { %3715 = vmatprep.subr.bf16.mxu0 %v4025_v56  ;;  %v3791_v60 = vpack.c.bf16 %v2647_v3, %v2646_v24 }
 0x615   : > { %3768 = vmatpush3.bf16.msra.mxu1 %v3767_v44 }
 0x616   : > { %3769 = vmatprep.subr.bf16.mxu1 %v4025_v56 }
 0x617   : > { %3717 = vmatpush3.bf16.msra.mxu0 %v3716_v52  ;;  %v2649_v52 = vld [vmem:[%s5453_s28 + $0x38] sm:$0xff] }
 0x618   : > { %3718 = vmatprep.subr.bf16.mxu0 %v4025_v56  ;;  %v3794_v4 = vpack.c.bf16 %v2649_v52, %v2648_v43 }
 0x619   : > { %3771 = vmatpush3.bf16.msra.mxu1 %v3770_v46 }
 0x61a   : > { %3772 = vmatprep.subr.bf16.mxu1 %v4025_v56 }
 0x61b   : > { %3720 = vmatpush3.bf16.msra.mxu0 %v3719_v6 }
 0x61c   : > { %3721 = vmatprep.subr.bf16.mxu0 %v4025_v56 }
 0x61d   : > { %3774 = vmatpush3.bf16.msra.mxu1 %v3773_v49 }
 0x61e   : > { %3775 = vmatprep.subr.bf16.mxu1 %v4025_v56 }
 0x61f   : > { %3723 = vmatpush3.bf16.msra.mxu0 %v3722_v9 }
 0x620   : > { %3724 = vmatprep.subr.bf16.mxu0 %v4025_v56 }
 0x621   : > { %3777 = vmatpush3.bf16.msra.mxu1 %v3776_v19 }
 0x622   : > { %3778 = vmatprep.subr.bf16.mxu1 %v4025_v56 }
 0x623   : > { %3726 = vmatpush3.bf16.msra.mxu0 %v3725_v12 }
 0x624   : > { %3745 = vmatprep.subr.bf16.mxu0 %v4025_v56 }
 0x625   : > { %3780 = vmatpush3.bf16.msra.mxu1 %v3779_v53 }
 0x626   : > { %3263 = vmatmul.mubr.msk.f32.vlgmr.msra.gmra.mrb[22].mxu0 %vm2055_vm0, %v2300_v16  ;;  %3781 = vmatprep.subr.bf16.mxu1 %v4025_v56 }
 0x627   : > { %3747 = vmatpush3.bf16.msra.mxu0 %v3746_v15  ;;  %3316 = vmatprep.mubr.msk.f32.mxu0 %vm4027_vm15, %v4024_v0 }
 0x628   : > { %3748 = vmatprep.subr.bf16.mxu0 %v4025_v56 }
 0x629   : > { %3783 = vmatpush3.bf16.msra.mxu1 %v3782_v57 }
 0x62a   : > { %3347 = vmatprep.subr.mxu1 %v4024_v0 }
 0x62b   : > { %3750 = vmatpush3.bf16.msra.mxu0 %v3749_v23 }
 0x62c   : > { %3751 = vmatprep.subr.bf16.mxu0 %v4025_v56 }
 0x62d   : > { %3348 = vmatpush3.msra.mxu1 %v2565_v58 }
 0x62f   : > { %3753 = vmatpush3.bf16.msra.mxu0 %v3752_v27 }
 0x630   : > { %3754 = vmatprep.subr.bf16.mxu0 %v4025_v56 }
 0x633   : > { %3756 = vmatpush3.bf16.msra.mxu0 %v3755_v30  ;;  %v2651_v30 = vld [vmem:[%s5453_s28 + $0x48] sm:$0xff] }
 0x634   : > { %3757 = vmatprep.subr.bf16.mxu0 %v4025_v56  ;;  %v3797_v31 = vpack.c.bf16 %v2651_v30, %v2650_v29 }
 0x637   : > { %3759 = vmatpush3.bf16.msra.mxu0 %v3758_v33  ;;  %v2566_v33 = vld [vmem:[%s5455_s26] sm:$0x1]  ;;  %s3946_s26 = scalar_lea.vmem %s5365_s13, 16 }
 0x638   : > { %3760 = vmatprep.subr.bf16.mxu0 %v4025_v56  ;;  %p3947_p4 = scmp.ne.s32.totalorder %s5365_s13, %s3946_s26  ;;  %p3954_p13 = scmp.lt.s32.totalorder %s3952_s16, %s3946_s26 }
 0x63a   : > { %p3948_p6 = pnand %p3947_p4, %p4200_p12  ;;  %p3955_p3 = por %p3954_p13, %p3953_p10 }
 0x63b   : > { %3762 = vmatpush3.bf16.msra.mxu0 %v3761_v37 }
 0x63c   : > { %3784 = vmatprep.subr.bf16.mxu0 %v4025_v56  ;;  %p3949_p8 = pneg %p3948_p6 }
 0x63e   : > { %3317 = vmatmul.mubr.msk.f32.vlgmr.msra.gmra.mrb[24].mxu0 %vm2055_vm0, %v2474_v38  ;;  %p3956_p7 = pnand %p3955_p3, %p3949_p8 }
 0x63f   : > { %3374 = vmatprep.mubr.msk.f32.mxu0 %vm4027_vm15, %v4024_v0  ;;  %3786 = vmatpush3.bf16.msra.mxu0 %v3785_v63 }
 0x640   : > { %3787 = vmatprep.subr.bf16.mxu0 %v4025_v56 }
 0x643   : > { %3789 = vmatpush3.bf16.msra.mxu0 %v3788_v2 }
 0x644   : > { %3790 = vmatprep.subr.bf16.mxu0 %v4025_v56 }
 0x647   : > { %3792 = vmatpush3.bf16.msra.mxu0 %v3791_v60 }
 0x648   : > { %3793 = vmatprep.subr.bf16.mxu0 %v4025_v56 }
 0x64b   : > { %3795 = vmatpush3.bf16.msra.mxu0 %v3794_v4 }
 0x64c   : > { %3796 = vmatprep.subr.bf16.mxu0 %v4025_v56 }
 0x64f   : > { %3798 = vmatpush3.bf16.msra.mxu0 %v3797_v31 }
 0x650   : > { %3372 = vmatprep.subr.mxu0 %v4024_v0  ;;  %v2653_v0 = vld [vmem:[%s5456_s17] sm:$0x1] }
 0x653   : > { %3373 = vmatpush3.msk.msra.mxu0 %vm1117_vm6, %v2652_v32 }
 0x6c9   : > { %v2124_v5 = vpop.f32.mrb[18].mxu0  ;;  %v2282_v6 = vpop.f32.mrb[18].mxu1 }
 0x6ca   : > { %v3183_v7 = vpop.f32.mrb[19].mxu0  ;;  %v3237_v8 = vpop.f32.mrb[19].mxu1 }
 0x6e1   : > { %v2196_v9 = vpop.f32.mrb[20].mxu0  ;;  %v2456_v10 = vpop.f32.mrb[20].mxu1 }
 0x6e2   : > { %v2197_v11 = vadd.f32 %v2196_v9, %v2124_v5  ;;  %v3210_v12 = vpop.f32.mrb[21].mxu0  ;;  %v3291_v13 = vpop.f32.mrb[21].mxu1 }
 0x6e4   : > { %v2286_v14 = vadd.f32 %v2282_v6, %v2197_v11 }
 0x6f9   : > { %v2369_v15 = vpop.f32.mrb[22].mxu0 }
 0x6fa   : > { %v2373_v16 = vadd.f32 %v2369_v15, %v2286_v14  ;;  %v3264_v17 = vpop.f32.mrb[23].mxu0 }
 0x6fc   : > { %v2460_v20 = vadd.f32 %v2456_v10, %v2373_v16 }
 0x711   : > { %v2543_v23 = vpop.f32.mrb[24].mxu0 }
 0x712   : > { %v2547_v56 = vadd.f32 %v2543_v23, %v2460_v20  ;;  %v3318_v26 = vpop.f32.mrb[25].mxu0 }
 0x714   : > { %v2549_v27 = vadd.f32 %v2548_v25, %v2547_v56 }
 0x716   : > { %v2550_v28 = vmax.f32 %v2549_v27, 0.0 }
 0x718   : > { %3350 = vmatmul.mubr.msk.f32.vlgmr.msra.gmra.mrb[22].mxu1 %vm2567_vm1, %v2550_v28 }
 0x7eb   : > { %v2637_v34 = vpop.f32.mrb[22].mxu1 }
 0x7ec   : > { %v2638_v35 = vadd.f32 %v2637_v34, %v2566_v33  ;;  %v3351_v37 = vpop.f32.mrb[23].mxu1 }
 0x7ee   : > { %v2641_v38 = vmax.f32 %v2638_v35, 0.0 }
 0x7f0   : > { %3375 = vmatmul.mubr.msk.f32.vlgmr.msra.gmra.mrb[26].mxu0 %vm2654_vm2, %v2641_v38 }
 0x8c3   : > { %v2727_v39 = vpop.f32.mrb[26].mxu0 }
 0x8c4   : > { %v2728_v40 = vadd.f32 %v2727_v39, %v2653_v0  ;;  %v3376_v41 = vpop.f32.mrb[27].mxu0 }
 0x8c6   : > { %2732 = vst.msk [vmem:[%s526_s10] sm:$0x1] %vm2731_vm3, %v2728_v40 }
 0x8c7   : > { %3959 = shalt.err (!%p3956_p7)
}
 0x8c8   : > { %s3960_s27 = scalar_lea.hbm %s5363_s23, 16  ;;  %s3964_s10 = scalar_lea.hbm %s5457_s29, 32 }
 0x8c9   : > { %p3961_p9 = scmp.ne.s32.totalorder %s5363_s23, %s3960_s27  ;;  %p3965_p5 = scmp.lt.u32.totalorder %s5363_s23, %s5457_s29 }
 0x8ca   : > { %p3966_p11 = scmp.lt.u32.totalorder %s3964_s10, %s3960_s27  ;;  %p3968_p4 = scmp.lt.u32.totalorder %s3960_s27, %s5363_s23 }
 0x8cb   : > { %p3962_p2 = pnand %p3961_p9, %p4200_p12 }
 0x8cc   : > { %p3967_p1 = por %p3966_p11, %p3965_p5 }
 0x8cd   : > { %p3963_p0 = pneg %p3962_p2 }
 0x8ce   : > { %p3969_p6 = por %p3968_p4, %p3967_p1 }
 0x8d0   : > { %p3970_p8 = pnand %p3969_p6, %p3963_p0 }
 0x8d2   : > { %3973 = shalt.err (!%p3970_p8)
}
 0x8d3   : > { %3829 = dma.vmem_to_hbm [thread:$0]  (%p4200_p12), %s5365_s13, 16, %s5363_s23, %s2734_s24  }
 0x8d4 PF: > { %s5458_s26 = sld [smem:[#allocation11_spill]]  ;;  %s5459_s22 = sld [smem:[#allocation12_spill]] }
 0x8d5   : > { %p5461_p13 = scmp.ge.s32.totalorder %s4016_s21, 2 }
 0x8da   : > { %s2758_s14 = sand.u32 1, %s5458_s26   ;;  %p5460_p10 = scmp.ne.s32.totalorder %s5459_s22, 0 }
 0x8db   : > { %s2759_s16 = scalar_lea.sflag [#allocation4], %s2758_s14 }
 0x8dc   : > { %p3840_p3 = pnand %p5461_p13, %p5460_p10 }
 0x8de   : > { %3999 = dma.done.wait (!%p3840_p3), %s2759_s16, 16  }
 0x8df   : > { %4001 = vsyncadd (!%p3840_p3), %s2759_s16, 4294967280  ;;  %s5462_s21 = sld [smem:[#allocation13_spill]]  ;;  %s5463_s18 = smov %s4008_s19 }
 0x8e0   : > { %s5464_s19 = smov %s4012_s20  ;;  %s5465_s20 = smov %s4196_s25 }
 0x8e5   : > { %p29_p7 = scmp.ge.s32.totalorder %s5462_s21, 4  }
 0x8e7   :  { %31 = sbr.rel (!%p29_p7) target bundleno = 12 (0xc), region = 142 }
 0x8ee   :  { %2763 = vsyncpa [#allocation3], 1 }
 0x8ef   :  { %2765 = vsyncpa [#allocation3 + $0x1], 1 }
 0x8f0   :  { %2766 = vsyncpa [#allocation6], 1 }
 0x8f1   :  { %2767 = vsyncpa [#allocation4], 1 }
 0x8f2   :  { %2769 = vsyncpa [#allocation4 + $0x1], 1 }

</bundles_post_ra>
